<compile_context>
chip_gen: v7x
topology: tpu7x:2x2x1
jax: 0.10.0
libtpu: 0.0.40
codegen_flags: <defaults>
</compile_context>

<pallas_src>
import jax
import jax.numpy as jnp
from jax import lax
from jax.experimental import pallas as pl
from jax.experimental.pallas import tpu as pltpu
import numpy as np


def lstm_net_kernel(ids_ref, emb_hbm, wih_ref, whh_ref, b_ref, wfc_ref, bfc_ref,
                    out_ref, emb_sc, dma_sems):
    seq, H = emb_sc.shape

    # --- Embedding gather: table stays in HBM; DMA only the touched rows.
    #     All row copies are issued back-to-back (in flight concurrently), then waited.
    copies = []
    for t in range(seq):  # seq is static; one-time staging, not the recurrence
        cp = pltpu.make_async_copy(
            emb_hbm.at[pl.ds(ids_ref[t], 1), :],
            emb_sc.at[pl.ds(t, 1), :],
            dma_sems.at[t],
        )
        cp.start()
        copies.append(cp)
    for cp in copies:
        cp.wait()

    # --- Hoisted input projection (+ fused bias): one (seq,H)@(H,4H) bf16 MXU matmul
    #     with f32 accumulation, kept off the serial recurrence path.
    gates_x = (jnp.dot(emb_sc[...].astype(jnp.bfloat16), wih_ref[...],
                       preferred_element_type=jnp.float32)
               + b_ref[...])                                         # (seq, 4H) f32

    whh = whh_ref[...]                    # (H, 4H) bf16, vreg-resident (2 vregs at H=32)

    # --- Fully-unrolled recurrence; h/c stay f32 in vregs (no scratch round trips).
    #     bf16 only on MXU operands; elementwise/transcendental path stays f32.
    h = jnp.zeros((1, H), jnp.float32)
    c = jnp.zeros((1, H), jnp.float32)
    for t in range(seq):
        gates = gates_x[t:t + 1, :] + jnp.dot(
            h.astype(jnp.bfloat16), whh, preferred_element_type=jnp.float32)  # (1, 4H)
        # Two full-vreg transcendentals per step (EUP), then static lane slices.
        sig = jax.nn.sigmoid(gates)
        th = jnp.tanh(gates)
        i = sig[:, 0 * H:1 * H]
        f = sig[:, 1 * H:2 * H]
        g = th[:, 2 * H:3 * H]
        o = sig[:, 3 * H:4 * H]
        c = f * c + i * g
        h = o * jnp.tanh(c)

    # --- Epilogue: lane-dense fc (O padded to a 128-lane multiple; padded bias lanes are
    #     -1e30 so they vanish in the softmax) + numerically-stable log-softmax.
    logits = jnp.dot(h.astype(jnp.bfloat16), wfc_ref[...],
                     preferred_element_type=jnp.float32) + bfc_ref[...]   # (1, O_pad)
    m = jnp.max(logits, axis=-1, keepdims=True)
    shifted = logits - m
    lse = jnp.log(jnp.sum(jnp.exp(shifted), axis=-1, keepdims=True))
    out_ref[...] = shifted - lse


def lstm_network_forward(token_ids, params):
    """token_ids: (seq,) int32. Returns (1, output_size) float32 log-probs."""
    emb_table = params["embedding"]        # (vocab, H)  -- stays in HBM
    w_ih = params["w_ih"]                  # (4H, H)  PyTorch layout
    w_hh = params["w_hh"]                  # (4H, H)
    b_ih = params["b_ih"]                  # (4H,)
    b_hh = params["b_hh"]                  # (4H,)
    w_fc = params["w_fc"]                  # (O, H)
    b_fc = params["b_fc"]                  # (O,)

    vocab, H = emb_table.shape
    O = w_fc.shape[0]
    seq = token_ids.shape[0]
    O_pad = ((O + 127) // 128) * 128       # lane-dense classifier output

    # Glue: transposes / bf16 casts / bias fusion / lane padding (once-per-call XLA prep).
    w_ih_t = jnp.transpose(w_ih).astype(jnp.bfloat16)                     # (H, 4H)
    w_hh_t = jnp.transpose(w_hh).astype(jnp.bfloat16)                     # (H, 4H)
    b = (b_ih + b_hh).reshape(1, 4 * H).astype(jnp.float32)               # (1, 4H)
    w_fc_t = jnp.pad(jnp.transpose(w_fc).astype(jnp.bfloat16),
                     ((0, 0), (0, O_pad - O)))                            # (H, O_pad)
    b_fc_p = jnp.pad(b_fc.reshape(1, O).astype(jnp.float32),
                     ((0, 0), (0, O_pad - O)),
                     constant_values=-1e30)                               # (1, O_pad)

    # Clamp ids: OOB refs have no runtime check on TPU.
    ids = jnp.clip(token_ids.astype(jnp.int32), 0, vocab - 1)

    # VMEM budget: the embedding table is not resident, so only the small weights count.
    # Explicit scoped limit keeps the design valid on v5e (16 MiB default) as well as
    # v6e/v7x (32 MiB default).
    vmem_limit = 16 * 1024 * 1024
    resident_bytes = (2 * (w_ih_t.size + w_hh_t.size + w_fc_t.size)      # bf16 weights
                      + 4 * (b.size + b_fc_p.size + O_pad)               # f32 biases + out
                      + 4 * seq * H)                                      # f32 emb scratch
    assert resident_bytes < vmem_limit // 2, (
        "resident LSTM weights no longer fit comfortably in scoped VMEM; stream the 4H "
        "gate axis with a grid (or shrink tiles) before scaling H further.")

    smem = pl.BlockSpec(memory_space=pltpu.MemorySpace.SMEM)
    vmem = pl.BlockSpec(memory_space=pltpu.MemorySpace.VMEM)
    hbm = pl.BlockSpec(memory_space=pl.ANY)

    out = pl.pallas_call(
        lstm_net_kernel,
        out_shape=jax.ShapeDtypeStruct((1, O_pad), jnp.float32),
        in_specs=[smem, hbm, vmem, vmem, vmem, vmem, vmem],
        out_specs=vmem,
        scratch_shapes=[
            pltpu.VMEM((seq, H), jnp.float32),     # gathered embedding rows
            pltpu.SemaphoreType.DMA((seq,)),       # one semaphore per row DMA
        ],
        compiler_params=pltpu.CompilerParams(vmem_limit_bytes=vmem_limit),
    )(ids, emb_table.astype(jnp.float32), w_ih_t, w_hh_t, b, w_fc_t, b_fc_p)
    return out[:, :O]


def lstm_network_reference(token_ids, params):
    """Pure-JAX reference matching PyTorch LSTM semantics (f32 end-to-end)."""
    emb_table = params["embedding"]
    w_ih, w_hh = params["w_ih"], params["w_hh"]
    b = params["b_ih"] + params["b_hh"]
    w_fc, b_fc = params["w_fc"], params["b_fc"]
    H = emb_table.shape[1]

    embedded = emb_table[token_ids]                      # (seq, H)

    def step(carry, x_t):
        h, c = carry
        gates = x_t @ w_ih.T + h @ w_hh.T + b
        i = jax.nn.sigmoid(gates[0 * H:1 * H])
        f = jax.nn.sigmoid(gates[1 * H:2 * H])
        g = jnp.tanh(gates[2 * H:3 * H])
        o = jax.nn.sigmoid(gates[3 * H:4 * H])
        c = f * c + i * g
        h = o * jnp.tanh(c)
        return (h, c), None

    (h, _), _ = lax.scan(step, (jnp.zeros((H,)), jnp.zeros((H,))), embedded)
    logits = h @ w_fc.T + b_fc
    return jax.nn.log_softmax(logits)[None, :]


def init_params(key, input_size, hidden_size, output_size):
    """Deterministic init mirroring PyTorch default initializers (shapes are what matter)."""
    H, O = hidden_size, output_size
    k = jax.random.split(key, 7)
    stdv = 1.0 / np.sqrt(H)
    return {
        "embedding": jax.random.normal(k[0], (input_size, H), jnp.float32),
        "w_ih": jax.random.uniform(k[1], (4 * H, H), jnp.float32, -stdv, stdv),
        "w_hh": jax.random.uniform(k[2], (4 * H, H), jnp.float32, -stdv, stdv),
        "b_ih": jax.random.uniform(k[3], (4 * H,), jnp.float32, -stdv, stdv),
        "b_hh": jax.random.uniform(k[4], (4 * H,), jnp.float32, -stdv, stdv),
        "w_fc": jax.random.uniform(k[5], (O, H), jnp.float32, -stdv, stdv),
        "b_fc": jax.random.uniform(k[6], (O,), jnp.float32, -stdv, stdv),
    }


if __name__ == "__main__":
    input_size = 16    # vocab
    hidden_size = 32
    output_size = 10
    seq_len = 8

    key = jax.random.PRNGKey(0)
    pkey, ikey = jax.random.split(key)
    params = init_params(pkey, input_size, hidden_size, output_size)
    token_ids = jax.random.randint(ikey, (seq_len,), 0, input_size, dtype=jnp.int32)

    out = lstm_network_forward(token_ids, params)
    out = jax.block_until_ready(out)

    ref = jax.block_until_ready(lstm_network_reference(token_ids, params))
    np.testing.assert_allclose(np.asarray(out), np.asarray(ref), rtol=1e-2, atol=1e-2)

    print("KERNEL_OK")
</pallas_src>

<mosaic_0001>
module attributes {stable_mosaic.version = 11 : i64} {
  func.func @lstm_net_kernel(%arg0: memref<8xi32, #tpu.memory_space<smem>>, %arg1: memref<16x32xf32, #tpu.memory_space<any>>, %arg2: memref<32x128xbf16, #tpu.memory_space<vmem>>, %arg3: memref<32x128xbf16, #tpu.memory_space<vmem>>, %arg4: memref<1x128xf32, #tpu.memory_space<vmem>>, %arg5: memref<32x128xbf16, #tpu.memory_space<vmem>>, %arg6: memref<1x128xf32, #tpu.memory_space<vmem>>, %arg7: memref<1x128xf32, #tpu.memory_space<vmem>>, %arg8: memref<8x32xf32, #tpu.memory_space<vmem>>, %arg9: memref<8x!tpu.dma_semaphore, #tpu.memory_space<semaphore_mem>>) attributes {dimension_semantics = [], scalar_prefetch = 0 : i64, scratch_operands = 2 : i64, tpu.core_type = #tpu.core_type<tc>} {
    %c0 = arith.constant 0 : index
    %0 = memref.load %arg0[%c0] : memref<8xi32, #tpu.memory_space<smem>>
    %c0_i32 = arith.constant 0 : i32
    %c0_i32_0 = arith.constant 0 : i32
    %1 = tpu.memref_slice %arg1[%0, %c0_i32_0] : memref<16x32xf32, #tpu.memory_space<any>> -> memref<1x32xf32, #tpu.memory_space<any>>
    %c0_i32_1 = arith.constant 0 : i32
    %c0_i32_2 = arith.constant 0 : i32
    %2 = tpu.memref_slice %arg8[%c0_i32_1, %c0_i32_2] : memref<8x32xf32, #tpu.memory_space<vmem>> -> memref<1x32xf32, #tpu.memory_space<vmem>>
    %3 = tpu.memref_slice %arg9[%c0_i32] : memref<8x!tpu.dma_semaphore, #tpu.memory_space<semaphore_mem>> -> memref<1x!tpu.dma_semaphore, #tpu.memory_space<semaphore_mem>>
    %4 = tpu.memref_squeeze %3 : memref<1x!tpu.dma_semaphore, #tpu.memory_space<semaphore_mem>> -> memref<!tpu.dma_semaphore, #tpu.memory_space<semaphore_mem>>
    tpu.enqueue_dma source(%1 : memref<1x32xf32, #tpu.memory_space<any>>) target(%2 : memref<1x32xf32, #tpu.memory_space<vmem>>) target_semaphore(%4 : memref<!tpu.dma_semaphore, #tpu.memory_space<semaphore_mem>>)
    %c1 = arith.constant 1 : index
    %5 = memref.load %arg0[%c1] : memref<8xi32, #tpu.memory_space<smem>>
    %c1_i32 = arith.constant 1 : i32
    %c0_i32_3 = arith.constant 0 : i32
    %6 = tpu.memref_slice %arg1[%5, %c0_i32_3] : memref<16x32xf32, #tpu.memory_space<any>> -> memref<1x32xf32, #tpu.memory_space<any>>
    %c1_i32_4 = arith.constant 1 : i32
    %c0_i32_5 = arith.constant 0 : i32
    %7 = tpu.memref_slice %arg8[%c1_i32_4, %c0_i32_5] : memref<8x32xf32, #tpu.memory_space<vmem>> -> memref<1x32xf32, #tpu.memory_space<vmem>>
    %8 = tpu.memref_slice %arg9[%c1_i32] : memref<8x!tpu.dma_semaphore, #tpu.memory_space<semaphore_mem>> -> memref<1x!tpu.dma_semaphore, #tpu.memory_space<semaphore_mem>>
    %9 = tpu.memref_squeeze %8 : memref<1x!tpu.dma_semaphore, #tpu.memory_space<semaphore_mem>> -> memref<!tpu.dma_semaphore, #tpu.memory_space<semaphore_mem>>
    tpu.enqueue_dma source(%6 : memref<1x32xf32, #tpu.memory_space<any>>) target(%7 : memref<1x32xf32, #tpu.memory_space<vmem>>) target_semaphore(%9 : memref<!tpu.dma_semaphore, #tpu.memory_space<semaphore_mem>>)
    %c2 = arith.constant 2 : index
    %10 = memref.load %arg0[%c2] : memref<8xi32, #tpu.memory_space<smem>>
    %c2_i32 = arith.constant 2 : i32
    %c0_i32_6 = arith.constant 0 : i32
    %11 = tpu.memref_slice %arg1[%10, %c0_i32_6] : memref<16x32xf32, #tpu.memory_space<any>> -> memref<1x32xf32, #tpu.memory_space<any>>
    %c2_i32_7 = arith.constant 2 : i32
    %c0_i32_8 = arith.constant 0 : i32
    %12 = tpu.memref_slice %arg8[%c2_i32_7, %c0_i32_8] : memref<8x32xf32, #tpu.memory_space<vmem>> -> memref<1x32xf32, #tpu.memory_space<vmem>>
    %13 = tpu.memref_slice %arg9[%c2_i32] : memref<8x!tpu.dma_semaphore, #tpu.memory_space<semaphore_mem>> -> memref<1x!tpu.dma_semaphore, #tpu.memory_space<semaphore_mem>>
    %14 = tpu.memref_squeeze %13 : memref<1x!tpu.dma_semaphore, #tpu.memory_space<semaphore_mem>> -> memref<!tpu.dma_semaphore, #tpu.memory_space<semaphore_mem>>
    tpu.enqueue_dma source(%11 : memref<1x32xf32, #tpu.memory_space<any>>) target(%12 : memref<1x32xf32, #tpu.memory_space<vmem>>) target_semaphore(%14 : memref<!tpu.dma_semaphore, #tpu.memory_space<semaphore_mem>>)
    %c3 = arith.constant 3 : index
    %15 = memref.load %arg0[%c3] : memref<8xi32, #tpu.memory_space<smem>>
    %c3_i32 = arith.constant 3 : i32
    %c0_i32_9 = arith.constant 0 : i32
    %16 = tpu.memref_slice %arg1[%15, %c0_i32_9] : memref<16x32xf32, #tpu.memory_space<any>> -> memref<1x32xf32, #tpu.memory_space<any>>
    %c3_i32_10 = arith.constant 3 : i32
    %c0_i32_11 = arith.constant 0 : i32
    %17 = tpu.memref_slice %arg8[%c3_i32_10, %c0_i32_11] : memref<8x32xf32, #tpu.memory_space<vmem>> -> memref<1x32xf32, #tpu.memory_space<vmem>>
    %18 = tpu.memref_slice %arg9[%c3_i32] : memref<8x!tpu.dma_semaphore, #tpu.memory_space<semaphore_mem>> -> memref<1x!tpu.dma_semaphore, #tpu.memory_space<semaphore_mem>>
    %19 = tpu.memref_squeeze %18 : memref<1x!tpu.dma_semaphore, #tpu.memory_space<semaphore_mem>> -> memref<!tpu.dma_semaphore, #tpu.memory_space<semaphore_mem>>
    tpu.enqueue_dma source(%16 : memref<1x32xf32, #tpu.memory_space<any>>) target(%17 : memref<1x32xf32, #tpu.memory_space<vmem>>) target_semaphore(%19 : memref<!tpu.dma_semaphore, #tpu.memory_space<semaphore_mem>>)
    %c4 = arith.constant 4 : index
    %20 = memref.load %arg0[%c4] : memref<8xi32, #tpu.memory_space<smem>>
    %c4_i32 = arith.constant 4 : i32
    %c0_i32_12 = arith.constant 0 : i32
    %21 = tpu.memref_slice %arg1[%20, %c0_i32_12] : memref<16x32xf32, #tpu.memory_space<any>> -> memref<1x32xf32, #tpu.memory_space<any>>
    %c4_i32_13 = arith.constant 4 : i32
    %c0_i32_14 = arith.constant 0 : i32
    %22 = tpu.memref_slice %arg8[%c4_i32_13, %c0_i32_14] : memref<8x32xf32, #tpu.memory_space<vmem>> -> memref<1x32xf32, #tpu.memory_space<vmem>>
    %23 = tpu.memref_slice %arg9[%c4_i32] : memref<8x!tpu.dma_semaphore, #tpu.memory_space<semaphore_mem>> -> memref<1x!tpu.dma_semaphore, #tpu.memory_space<semaphore_mem>>
    %24 = tpu.memref_squeeze %23 : memref<1x!tpu.dma_semaphore, #tpu.memory_space<semaphore_mem>> -> memref<!tpu.dma_semaphore, #tpu.memory_space<semaphore_mem>>
    tpu.enqueue_dma source(%21 : memref<1x32xf32, #tpu.memory_space<any>>) target(%22 : memref<1x32xf32, #tpu.memory_space<vmem>>) target_semaphore(%24 : memref<!tpu.dma_semaphore, #tpu.memory_space<semaphore_mem>>)
    %c5 = arith.constant 5 : index
    %25 = memref.load %arg0[%c5] : memref<8xi32, #tpu.memory_space<smem>>
    %c5_i32 = arith.constant 5 : i32
    %c0_i32_15 = arith.constant 0 : i32
    %26 = tpu.memref_slice %arg1[%25, %c0_i32_15] : memref<16x32xf32, #tpu.memory_space<any>> -> memref<1x32xf32, #tpu.memory_space<any>>
    %c5_i32_16 = arith.constant 5 : i32
    %c0_i32_17 = arith.constant 0 : i32
    %27 = tpu.memref_slice %arg8[%c5_i32_16, %c0_i32_17] : memref<8x32xf32, #tpu.memory_space<vmem>> -> memref<1x32xf32, #tpu.memory_space<vmem>>
    %28 = tpu.memref_slice %arg9[%c5_i32] : memref<8x!tpu.dma_semaphore, #tpu.memory_space<semaphore_mem>> -> memref<1x!tpu.dma_semaphore, #tpu.memory_space<semaphore_mem>>
    %29 = tpu.memref_squeeze %28 : memref<1x!tpu.dma_semaphore, #tpu.memory_space<semaphore_mem>> -> memref<!tpu.dma_semaphore, #tpu.memory_space<semaphore_mem>>
    tpu.enqueue_dma source(%26 : memref<1x32xf32, #tpu.memory_space<any>>) target(%27 : memref<1x32xf32, #tpu.memory_space<vmem>>) target_semaphore(%29 : memref<!tpu.dma_semaphore, #tpu.memory_space<semaphore_mem>>)
    %c6 = arith.constant 6 : index
    %30 = memref.load %arg0[%c6] : memref<8xi32, #tpu.memory_space<smem>>
    %c6_i32 = arith.constant 6 : i32
    %c0_i32_18 = arith.constant 0 : i32
    %31 = tpu.memref_slice %arg1[%30, %c0_i32_18] : memref<16x32xf32, #tpu.memory_space<any>> -> memref<1x32xf32, #tpu.memory_space<any>>
    %c6_i32_19 = arith.constant 6 : i32
    %c0_i32_20 = arith.constant 0 : i32
    %32 = tpu.memref_slice %arg8[%c6_i32_19, %c0_i32_20] : memref<8x32xf32, #tpu.memory_space<vmem>> -> memref<1x32xf32, #tpu.memory_space<vmem>>
    %33 = tpu.memref_slice %arg9[%c6_i32] : memref<8x!tpu.dma_semaphore, #tpu.memory_space<semaphore_mem>> -> memref<1x!tpu.dma_semaphore, #tpu.memory_space<semaphore_mem>>
    %34 = tpu.memref_squeeze %33 : memref<1x!tpu.dma_semaphore, #tpu.memory_space<semaphore_mem>> -> memref<!tpu.dma_semaphore, #tpu.memory_space<semaphore_mem>>
    tpu.enqueue_dma source(%31 : memref<1x32xf32, #tpu.memory_space<any>>) target(%32 : memref<1x32xf32, #tpu.memory_space<vmem>>) target_semaphore(%34 : memref<!tpu.dma_semaphore, #tpu.memory_space<semaphore_mem>>)
    %c7 = arith.constant 7 : index
    %35 = memref.load %arg0[%c7] : memref<8xi32, #tpu.memory_space<smem>>
    %c7_i32 = arith.constant 7 : i32
    %c0_i32_21 = arith.constant 0 : i32
    %36 = tpu.memref_slice %arg1[%35, %c0_i32_21] : memref<16x32xf32, #tpu.memory_space<any>> -> memref<1x32xf32, #tpu.memory_space<any>>
    %c7_i32_22 = arith.constant 7 : i32
    %c0_i32_23 = arith.constant 0 : i32
    %37 = tpu.memref_slice %arg8[%c7_i32_22, %c0_i32_23] : memref<8x32xf32, #tpu.memory_space<vmem>> -> memref<1x32xf32, #tpu.memory_space<vmem>>
    %38 = tpu.memref_slice %arg9[%c7_i32] : memref<8x!tpu.dma_semaphore, #tpu.memory_space<semaphore_mem>> -> memref<1x!tpu.dma_semaphore, #tpu.memory_space<semaphore_mem>>
    %39 = tpu.memref_squeeze %38 : memref<1x!tpu.dma_semaphore, #tpu.memory_space<semaphore_mem>> -> memref<!tpu.dma_semaphore, #tpu.memory_space<semaphore_mem>>
    tpu.enqueue_dma source(%36 : memref<1x32xf32, #tpu.memory_space<any>>) target(%37 : memref<1x32xf32, #tpu.memory_space<vmem>>) target_semaphore(%39 : memref<!tpu.dma_semaphore, #tpu.memory_space<semaphore_mem>>)
    %c0_i32_24 = arith.constant 0 : i32
    %c0_i32_25 = arith.constant 0 : i32
    %40 = tpu.memref_slice %arg1[%0, %c0_i32_25] : memref<16x32xf32, #tpu.memory_space<any>> -> memref<1x32xf32, #tpu.memory_space<any>>
    %c0_i32_26 = arith.constant 0 : i32
    %c0_i32_27 = arith.constant 0 : i32
    %41 = tpu.memref_slice %arg8[%c0_i32_26, %c0_i32_27] : memref<8x32xf32, #tpu.memory_space<vmem>> -> memref<1x32xf32, #tpu.memory_space<vmem>>
    %42 = tpu.memref_slice %arg9[%c0_i32_24] : memref<8x!tpu.dma_semaphore, #tpu.memory_space<semaphore_mem>> -> memref<1x!tpu.dma_semaphore, #tpu.memory_space<semaphore_mem>>
    %43 = tpu.memref_squeeze %42 : memref<1x!tpu.dma_semaphore, #tpu.memory_space<semaphore_mem>> -> memref<!tpu.dma_semaphore, #tpu.memory_space<semaphore_mem>>
    tpu.wait_dma2 semaphore(%43 : memref<!tpu.dma_semaphore, #tpu.memory_space<semaphore_mem>>) src(%40 : memref<1x32xf32, #tpu.memory_space<any>>) dst(%41 : memref<1x32xf32, #tpu.memory_space<vmem>>)
    %c1_i32_28 = arith.constant 1 : i32
    %c0_i32_29 = arith.constant 0 : i32
    %44 = tpu.memref_slice %arg1[%5, %c0_i32_29] : memref<16x32xf32, #tpu.memory_space<any>> -> memref<1x32xf32, #tpu.memory_space<any>>
    %c1_i32_30 = arith.constant 1 : i32
    %c0_i32_31 = arith.constant 0 : i32
    %45 = tpu.memref_slice %arg8[%c1_i32_30, %c0_i32_31] : memref<8x32xf32, #tpu.memory_space<vmem>> -> memref<1x32xf32, #tpu.memory_space<vmem>>
    %46 = tpu.memref_slice %arg9[%c1_i32_28] : memref<8x!tpu.dma_semaphore, #tpu.memory_space<semaphore_mem>> -> memref<1x!tpu.dma_semaphore, #tpu.memory_space<semaphore_mem>>
    %47 = tpu.memref_squeeze %46 : memref<1x!tpu.dma_semaphore, #tpu.memory_space<semaphore_mem>> -> memref<!tpu.dma_semaphore, #tpu.memory_space<semaphore_mem>>
    tpu.wait_dma2 semaphore(%47 : memref<!tpu.dma_semaphore, #tpu.memory_space<semaphore_mem>>) src(%44 : memref<1x32xf32, #tpu.memory_space<any>>) dst(%45 : memref<1x32xf32, #tpu.memory_space<vmem>>)
    %c2_i32_32 = arith.constant 2 : i32
    %c0_i32_33 = arith.constant 0 : i32
    %48 = tpu.memref_slice %arg1[%10, %c0_i32_33] : memref<16x32xf32, #tpu.memory_space<any>> -> memref<1x32xf32, #tpu.memory_space<any>>
    %c2_i32_34 = arith.constant 2 : i32
    %c0_i32_35 = arith.constant 0 : i32
    %49 = tpu.memref_slice %arg8[%c2_i32_34, %c0_i32_35] : memref<8x32xf32, #tpu.memory_space<vmem>> -> memref<1x32xf32, #tpu.memory_space<vmem>>
    %50 = tpu.memref_slice %arg9[%c2_i32_32] : memref<8x!tpu.dma_semaphore, #tpu.memory_space<semaphore_mem>> -> memref<1x!tpu.dma_semaphore, #tpu.memory_space<semaphore_mem>>
    %51 = tpu.memref_squeeze %50 : memref<1x!tpu.dma_semaphore, #tpu.memory_space<semaphore_mem>> -> memref<!tpu.dma_semaphore, #tpu.memory_space<semaphore_mem>>
    tpu.wait_dma2 semaphore(%51 : memref<!tpu.dma_semaphore, #tpu.memory_space<semaphore_mem>>) src(%48 : memref<1x32xf32, #tpu.memory_space<any>>) dst(%49 : memref<1x32xf32, #tpu.memory_space<vmem>>)
    %c3_i32_36 = arith.constant 3 : i32
    %c0_i32_37 = arith.constant 0 : i32
    %52 = tpu.memref_slice %arg1[%15, %c0_i32_37] : memref<16x32xf32, #tpu.memory_space<any>> -> memref<1x32xf32, #tpu.memory_space<any>>
    %c3_i32_38 = arith.constant 3 : i32
    %c0_i32_39 = arith.constant 0 : i32
    %53 = tpu.memref_slice %arg8[%c3_i32_38, %c0_i32_39] : memref<8x32xf32, #tpu.memory_space<vmem>> -> memref<1x32xf32, #tpu.memory_space<vmem>>
    %54 = tpu.memref_slice %arg9[%c3_i32_36] : memref<8x!tpu.dma_semaphore, #tpu.memory_space<semaphore_mem>> -> memref<1x!tpu.dma_semaphore, #tpu.memory_space<semaphore_mem>>
    %55 = tpu.memref_squeeze %54 : memref<1x!tpu.dma_semaphore, #tpu.memory_space<semaphore_mem>> -> memref<!tpu.dma_semaphore, #tpu.memory_space<semaphore_mem>>
    tpu.wait_dma2 semaphore(%55 : memref<!tpu.dma_semaphore, #tpu.memory_space<semaphore_mem>>) src(%52 : memref<1x32xf32, #tpu.memory_space<any>>) dst(%53 : memref<1x32xf32, #tpu.memory_space<vmem>>)
    %c4_i32_40 = arith.constant 4 : i32
    %c0_i32_41 = arith.constant 0 : i32
    %56 = tpu.memref_slice %arg1[%20, %c0_i32_41] : memref<16x32xf32, #tpu.memory_space<any>> -> memref<1x32xf32, #tpu.memory_space<any>>
    %c4_i32_42 = arith.constant 4 : i32
    %c0_i32_43 = arith.constant 0 : i32
    %57 = tpu.memref_slice %arg8[%c4_i32_42, %c0_i32_43] : memref<8x32xf32, #tpu.memory_space<vmem>> -> memref<1x32xf32, #tpu.memory_space<vmem>>
    %58 = tpu.memref_slice %arg9[%c4_i32_40] : memref<8x!tpu.dma_semaphore, #tpu.memory_space<semaphore_mem>> -> memref<1x!tpu.dma_semaphore, #tpu.memory_space<semaphore_mem>>
    %59 = tpu.memref_squeeze %58 : memref<1x!tpu.dma_semaphore, #tpu.memory_space<semaphore_mem>> -> memref<!tpu.dma_semaphore, #tpu.memory_space<semaphore_mem>>
    tpu.wait_dma2 semaphore(%59 : memref<!tpu.dma_semaphore, #tpu.memory_space<semaphore_mem>>) src(%56 : memref<1x32xf32, #tpu.memory_space<any>>) dst(%57 : memref<1x32xf32, #tpu.memory_space<vmem>>)
    %c5_i32_44 = arith.constant 5 : i32
    %c0_i32_45 = arith.constant 0 : i32
    %60 = tpu.memref_slice %arg1[%25, %c0_i32_45] : memref<16x32xf32, #tpu.memory_space<any>> -> memref<1x32xf32, #tpu.memory_space<any>>
    %c5_i32_46 = arith.constant 5 : i32
    %c0_i32_47 = arith.constant 0 : i32
    %61 = tpu.memref_slice %arg8[%c5_i32_46, %c0_i32_47] : memref<8x32xf32, #tpu.memory_space<vmem>> -> memref<1x32xf32, #tpu.memory_space<vmem>>
    %62 = tpu.memref_slice %arg9[%c5_i32_44] : memref<8x!tpu.dma_semaphore, #tpu.memory_space<semaphore_mem>> -> memref<1x!tpu.dma_semaphore, #tpu.memory_space<semaphore_mem>>
    %63 = tpu.memref_squeeze %62 : memref<1x!tpu.dma_semaphore, #tpu.memory_space<semaphore_mem>> -> memref<!tpu.dma_semaphore, #tpu.memory_space<semaphore_mem>>
    tpu.wait_dma2 semaphore(%63 : memref<!tpu.dma_semaphore, #tpu.memory_space<semaphore_mem>>) src(%60 : memref<1x32xf32, #tpu.memory_space<any>>) dst(%61 : memref<1x32xf32, #tpu.memory_space<vmem>>)
    %c6_i32_48 = arith.constant 6 : i32
    %c0_i32_49 = arith.constant 0 : i32
    %64 = tpu.memref_slice %arg1[%30, %c0_i32_49] : memref<16x32xf32, #tpu.memory_space<any>> -> memref<1x32xf32, #tpu.memory_space<any>>
    %c6_i32_50 = arith.constant 6 : i32
    %c0_i32_51 = arith.constant 0 : i32
    %65 = tpu.memref_slice %arg8[%c6_i32_50, %c0_i32_51] : memref<8x32xf32, #tpu.memory_space<vmem>> -> memref<1x32xf32, #tpu.memory_space<vmem>>
    %66 = tpu.memref_slice %arg9[%c6_i32_48] : memref<8x!tpu.dma_semaphore, #tpu.memory_space<semaphore_mem>> -> memref<1x!tpu.dma_semaphore, #tpu.memory_space<semaphore_mem>>
    %67 = tpu.memref_squeeze %66 : memref<1x!tpu.dma_semaphore, #tpu.memory_space<semaphore_mem>> -> memref<!tpu.dma_semaphore, #tpu.memory_space<semaphore_mem>>
    tpu.wait_dma2 semaphore(%67 : memref<!tpu.dma_semaphore, #tpu.memory_space<semaphore_mem>>) src(%64 : memref<1x32xf32, #tpu.memory_space<any>>) dst(%65 : memref<1x32xf32, #tpu.memory_space<vmem>>)
    %c7_i32_52 = arith.constant 7 : i32
    %c0_i32_53 = arith.constant 0 : i32
    %68 = tpu.memref_slice %arg1[%35, %c0_i32_53] : memref<16x32xf32, #tpu.memory_space<any>> -> memref<1x32xf32, #tpu.memory_space<any>>
    %c7_i32_54 = arith.constant 7 : i32
    %c0_i32_55 = arith.constant 0 : i32
    %69 = tpu.memref_slice %arg8[%c7_i32_54, %c0_i32_55] : memref<8x32xf32, #tpu.memory_space<vmem>> -> memref<1x32xf32, #tpu.memory_space<vmem>>
    %70 = tpu.memref_slice %arg9[%c7_i32_52] : memref<8x!tpu.dma_semaphore, #tpu.memory_space<semaphore_mem>> -> memref<1x!tpu.dma_semaphore, #tpu.memory_space<semaphore_mem>>
    %71 = tpu.memref_squeeze %70 : memref<1x!tpu.dma_semaphore, #tpu.memory_space<semaphore_mem>> -> memref<!tpu.dma_semaphore, #tpu.memory_space<semaphore_mem>>
    tpu.wait_dma2 semaphore(%71 : memref<!tpu.dma_semaphore, #tpu.memory_space<semaphore_mem>>) src(%68 : memref<1x32xf32, #tpu.memory_space<any>>) dst(%69 : memref<1x32xf32, #tpu.memory_space<vmem>>)
    %c0_56 = arith.constant 0 : index
    %c0_57 = arith.constant 0 : index
    %72 = vector.load %arg8[%c0_56, %c0_57] : memref<8x32xf32, #tpu.memory_space<vmem>>, vector<8x32xf32>
    %73 = arith.truncf %72 : vector<8x32xf32> to vector<8x32xbf16>
    %c0_58 = arith.constant 0 : index
    %c0_59 = arith.constant 0 : index
    %74 = vector.load %arg2[%c0_58, %c0_59] : memref<32x128xbf16, #tpu.memory_space<vmem>>, vector<32x128xbf16>
    %cst = arith.constant dense<0.000000e+00> : vector<8x128xf32>
    %75 = tpu.matmul %73, %74, %cst {dimension_numbers = #tpu.dot_dimension_numbers<[1], [0], [0], [1], [0, 0, 1, 1], [], []>} : vector<8x32xbf16>, vector<32x128xbf16>, vector<8x128xf32> -> vector<8x128xf32>
    %c0_60 = arith.constant 0 : index
    %c0_61 = arith.constant 0 : index
    %76 = vector.load %arg4[%c0_60, %c0_61] : memref<1x128xf32, #tpu.memory_space<vmem>>, vector<1x128xf32>
    %77 = vector.broadcast %76 : vector<1x128xf32> to vector<8x128xf32>
    %78 = arith.addf %75, %77 : vector<8x128xf32>
    %c0_62 = arith.constant 0 : index
    %c0_63 = arith.constant 0 : index
    %79 = vector.load %arg3[%c0_62, %c0_63] : memref<32x128xbf16, #tpu.memory_space<vmem>>, vector<32x128xbf16>
    %cst_64 = arith.constant 0.000000e+00 : f32
    %80 = vector.broadcast %cst_64 : f32 to vector<1x32xf32>
    %cst_65 = arith.constant 0.000000e+00 : f32
    %81 = vector.broadcast %cst_65 : f32 to vector<1x32xf32>
    %82 = vector.extract_strided_slice %78 {offsets = [0, 0], sizes = [1, 128], strides = [1, 1]} : vector<8x128xf32> to vector<1x128xf32>
    %83 = arith.truncf %80 : vector<1x32xf32> to vector<1x32xbf16>
    %cst_66 = arith.constant dense<0.000000e+00> : vector<1x128xf32>
    %84 = tpu.matmul %83, %79, %cst_66 {dimension_numbers = #tpu.dot_dimension_numbers<[1], [0], [0], [1], [0, 0, 1, 1], [], []>} : vector<1x32xbf16>, vector<32x128xbf16>, vector<1x128xf32> -> vector<1x128xf32>
    %85 = arith.addf %82, %84 : vector<1x128xf32>
    %86 = arith.negf %85 : vector<1x128xf32>
    %87 = math.exp %86 : vector<1x128xf32>
    %cst_67 = arith.constant 1.000000e+00 : f32
    %88 = vector.broadcast %cst_67 : f32 to vector<1x128xf32>
    %89 = arith.addf %88, %87 : vector<1x128xf32>
    %90 = arith.divf %88, %89 : vector<1x128xf32>
    %91 = math.tanh %85 : vector<1x128xf32>
    %92 = vector.extract_strided_slice %90 {offsets = [0, 0], sizes = [1, 32], strides = [1, 1]} : vector<1x128xf32> to vector<1x32xf32>
    %93 = vector.extract_strided_slice %90 {offsets = [0, 32], sizes = [1, 32], strides = [1, 1]} : vector<1x128xf32> to vector<1x32xf32>
    %94 = vector.extract_strided_slice %91 {offsets = [0, 64], sizes = [1, 32], strides = [1, 1]} : vector<1x128xf32> to vector<1x32xf32>
    %95 = vector.extract_strided_slice %90 {offsets = [0, 96], sizes = [1, 32], strides = [1, 1]} : vector<1x128xf32> to vector<1x32xf32>
    %96 = arith.mulf %93, %81 : vector<1x32xf32>
    %97 = arith.mulf %92, %94 : vector<1x32xf32>
    %98 = arith.addf %96, %97 : vector<1x32xf32>
    %99 = math.tanh %98 : vector<1x32xf32>
    %100 = arith.mulf %95, %99 : vector<1x32xf32>
    %101 = vector.extract_strided_slice %78 {offsets = [1, 0], sizes = [1, 128], strides = [1, 1]} : vector<8x128xf32> to vector<1x128xf32>
    %102 = arith.truncf %100 : vector<1x32xf32> to vector<1x32xbf16>
    %cst_68 = arith.constant dense<0.000000e+00> : vector<1x128xf32>
    %103 = tpu.matmul %102, %79, %cst_68 {dimension_numbers = #tpu.dot_dimension_numbers<[1], [0], [0], [1], [0, 0, 1, 1], [], []>} : vector<1x32xbf16>, vector<32x128xbf16>, vector<1x128xf32> -> vector<1x128xf32>
    %104 = arith.addf %101, %103 : vector<1x128xf32>
    %105 = arith.negf %104 : vector<1x128xf32>
    %106 = math.exp %105 : vector<1x128xf32>
    %cst_69 = arith.constant 1.000000e+00 : f32
    %107 = vector.broadcast %cst_69 : f32 to vector<1x128xf32>
    %108 = arith.addf %107, %106 : vector<1x128xf32>
    %109 = arith.divf %107, %108 : vector<1x128xf32>
    %110 = math.tanh %104 : vector<1x128xf32>
    %111 = vector.extract_strided_slice %109 {offsets = [0, 0], sizes = [1, 32], strides = [1, 1]} : vector<1x128xf32> to vector<1x32xf32>
    %112 = vector.extract_strided_slice %109 {offsets = [0, 32], sizes = [1, 32], strides = [1, 1]} : vector<1x128xf32> to vector<1x32xf32>
    %113 = vector.extract_strided_slice %110 {offsets = [0, 64], sizes = [1, 32], strides = [1, 1]} : vector<1x128xf32> to vector<1x32xf32>
    %114 = vector.extract_strided_slice %109 {offsets = [0, 96], sizes = [1, 32], strides = [1, 1]} : vector<1x128xf32> to vector<1x32xf32>
    %115 = arith.mulf %112, %98 : vector<1x32xf32>
    %116 = arith.mulf %111, %113 : vector<1x32xf32>
    %117 = arith.addf %115, %116 : vector<1x32xf32>
    %118 = math.tanh %117 : vector<1x32xf32>
    %119 = arith.mulf %114, %118 : vector<1x32xf32>
    %120 = vector.extract_strided_slice %78 {offsets = [2, 0], sizes = [1, 128], strides = [1, 1]} : vector<8x128xf32> to vector<1x128xf32>
    %121 = arith.truncf %119 : vector<1x32xf32> to vector<1x32xbf16>
    %cst_70 = arith.constant dense<0.000000e+00> : vector<1x128xf32>
    %122 = tpu.matmul %121, %79, %cst_70 {dimension_numbers = #tpu.dot_dimension_numbers<[1], [0], [0], [1], [0, 0, 1, 1], [], []>} : vector<1x32xbf16>, vector<32x128xbf16>, vector<1x128xf32> -> vector<1x128xf32>
    %123 = arith.addf %120, %122 : vector<1x128xf32>
    %124 = arith.negf %123 : vector<1x128xf32>
    %125 = math.exp %124 : vector<1x128xf32>
    %cst_71 = arith.constant 1.000000e+00 : f32
    %126 = vector.broadcast %cst_71 : f32 to vector<1x128xf32>
    %127 = arith.addf %126, %125 : vector<1x128xf32>
    %128 = arith.divf %126, %127 : vector<1x128xf32>
    %129 = math.tanh %123 : vector<1x128xf32>
    %130 = vector.extract_strided_slice %128 {offsets = [0, 0], sizes = [1, 32], strides = [1, 1]} : vector<1x128xf32> to vector<1x32xf32>
    %131 = vector.extract_strided_slice %128 {offsets = [0, 32], sizes = [1, 32], strides = [1, 1]} : vector<1x128xf32> to vector<1x32xf32>
    %132 = vector.extract_strided_slice %129 {offsets = [0, 64], sizes = [1, 32], strides = [1, 1]} : vector<1x128xf32> to vector<1x32xf32>
    %133 = vector.extract_strided_slice %128 {offsets = [0, 96], sizes = [1, 32], strides = [1, 1]} : vector<1x128xf32> to vector<1x32xf32>
    %134 = arith.mulf %131, %117 : vector<1x32xf32>
    %135 = arith.mulf %130, %132 : vector<1x32xf32>
    %136 = arith.addf %134, %135 : vector<1x32xf32>
    %137 = math.tanh %136 : vector<1x32xf32>
    %138 = arith.mulf %133, %137 : vector<1x32xf32>
    %139 = vector.extract_strided_slice %78 {offsets = [3, 0], sizes = [1, 128], strides = [1, 1]} : vector<8x128xf32> to vector<1x128xf32>
    %140 = arith.truncf %138 : vector<1x32xf32> to vector<1x32xbf16>
    %cst_72 = arith.constant dense<0.000000e+00> : vector<1x128xf32>
    %141 = tpu.matmul %140, %79, %cst_72 {dimension_numbers = #tpu.dot_dimension_numbers<[1], [0], [0], [1], [0, 0, 1, 1], [], []>} : vector<1x32xbf16>, vector<32x128xbf16>, vector<1x128xf32> -> vector<1x128xf32>
    %142 = arith.addf %139, %141 : vector<1x128xf32>
    %143 = arith.negf %142 : vector<1x128xf32>
    %144 = math.exp %143 : vector<1x128xf32>
    %cst_73 = arith.constant 1.000000e+00 : f32
    %145 = vector.broadcast %cst_73 : f32 to vector<1x128xf32>
    %146 = arith.addf %145, %144 : vector<1x128xf32>
    %147 = arith.divf %145, %146 : vector<1x128xf32>
    %148 = math.tanh %142 : vector<1x128xf32>
    %149 = vector.extract_strided_slice %147 {offsets = [0, 0], sizes = [1, 32], strides = [1, 1]} : vector<1x128xf32> to vector<1x32xf32>
    %150 = vector.extract_strided_slice %147 {offsets = [0, 32], sizes = [1, 32], strides = [1, 1]} : vector<1x128xf32> to vector<1x32xf32>
    %151 = vector.extract_strided_slice %148 {offsets = [0, 64], sizes = [1, 32], strides = [1, 1]} : vector<1x128xf32> to vector<1x32xf32>
    %152 = vector.extract_strided_slice %147 {offsets = [0, 96], sizes = [1, 32], strides = [1, 1]} : vector<1x128xf32> to vector<1x32xf32>
    %153 = arith.mulf %150, %136 : vector<1x32xf32>
    %154 = arith.mulf %149, %151 : vector<1x32xf32>
    %155 = arith.addf %153, %154 : vector<1x32xf32>
    %156 = math.tanh %155 : vector<1x32xf32>
    %157 = arith.mulf %152, %156 : vector<1x32xf32>
    %158 = vector.extract_strided_slice %78 {offsets = [4, 0], sizes = [1, 128], strides = [1, 1]} : vector<8x128xf32> to vector<1x128xf32>
    %159 = arith.truncf %157 : vector<1x32xf32> to vector<1x32xbf16>
    %cst_74 = arith.constant dense<0.000000e+00> : vector<1x128xf32>
    %160 = tpu.matmul %159, %79, %cst_74 {dimension_numbers = #tpu.dot_dimension_numbers<[1], [0], [0], [1], [0, 0, 1, 1], [], []>} : vector<1x32xbf16>, vector<32x128xbf16>, vector<1x128xf32> -> vector<1x128xf32>
    %161 = arith.addf %158, %160 : vector<1x128xf32>
    %162 = arith.negf %161 : vector<1x128xf32>
    %163 = math.exp %162 : vector<1x128xf32>
    %cst_75 = arith.constant 1.000000e+00 : f32
    %164 = vector.broadcast %cst_75 : f32 to vector<1x128xf32>
    %165 = arith.addf %164, %163 : vector<1x128xf32>
    %166 = arith.divf %164, %165 : vector<1x128xf32>
    %167 = math.tanh %161 : vector<1x128xf32>
    %168 = vector.extract_strided_slice %166 {offsets = [0, 0], sizes = [1, 32], strides = [1, 1]} : vector<1x128xf32> to vector<1x32xf32>
    %169 = vector.extract_strided_slice %166 {offsets = [0, 32], sizes = [1, 32], strides = [1, 1]} : vector<1x128xf32> to vector<1x32xf32>
    %170 = vector.extract_strided_slice %167 {offsets = [0, 64], sizes = [1, 32], strides = [1, 1]} : vector<1x128xf32> to vector<1x32xf32>
    %171 = vector.extract_strided_slice %166 {offsets = [0, 96], sizes = [1, 32], strides = [1, 1]} : vector<1x128xf32> to vector<1x32xf32>
    %172 = arith.mulf %169, %155 : vector<1x32xf32>
    %173 = arith.mulf %168, %170 : vector<1x32xf32>
    %174 = arith.addf %172, %173 : vector<1x32xf32>
    %175 = math.tanh %174 : vector<1x32xf32>
    %176 = arith.mulf %171, %175 : vector<1x32xf32>
    %177 = vector.extract_strided_slice %78 {offsets = [5, 0], sizes = [1, 128], strides = [1, 1]} : vector<8x128xf32> to vector<1x128xf32>
    %178 = arith.truncf %176 : vector<1x32xf32> to vector<1x32xbf16>
    %cst_76 = arith.constant dense<0.000000e+00> : vector<1x128xf32>
    %179 = tpu.matmul %178, %79, %cst_76 {dimension_numbers = #tpu.dot_dimension_numbers<[1], [0], [0], [1], [0, 0, 1, 1], [], []>} : vector<1x32xbf16>, vector<32x128xbf16>, vector<1x128xf32> -> vector<1x128xf32>
    %180 = arith.addf %177, %179 : vector<1x128xf32>
    %181 = arith.negf %180 : vector<1x128xf32>
    %182 = math.exp %181 : vector<1x128xf32>
    %cst_77 = arith.constant 1.000000e+00 : f32
    %183 = vector.broadcast %cst_77 : f32 to vector<1x128xf32>
    %184 = arith.addf %183, %182 : vector<1x128xf32>
    %185 = arith.divf %183, %184 : vector<1x128xf32>
    %186 = math.tanh %180 : vector<1x128xf32>
    %187 = vector.extract_strided_slice %185 {offsets = [0, 0], sizes = [1, 32], strides = [1, 1]} : vector<1x128xf32> to vector<1x32xf32>
    %188 = vector.extract_strided_slice %185 {offsets = [0, 32], sizes = [1, 32], strides = [1, 1]} : vector<1x128xf32> to vector<1x32xf32>
    %189 = vector.extract_strided_slice %186 {offsets = [0, 64], sizes = [1, 32], strides = [1, 1]} : vector<1x128xf32> to vector<1x32xf32>
    %190 = vector.extract_strided_slice %185 {offsets = [0, 96], sizes = [1, 32], strides = [1, 1]} : vector<1x128xf32> to vector<1x32xf32>
    %191 = arith.mulf %188, %174 : vector<1x32xf32>
    %192 = arith.mulf %187, %189 : vector<1x32xf32>
    %193 = arith.addf %191, %192 : vector<1x32xf32>
    %194 = math.tanh %193 : vector<1x32xf32>
    %195 = arith.mulf %190, %194 : vector<1x32xf32>
    %196 = vector.extract_strided_slice %78 {offsets = [6, 0], sizes = [1, 128], strides = [1, 1]} : vector<8x128xf32> to vector<1x128xf32>
    %197 = arith.truncf %195 : vector<1x32xf32> to vector<1x32xbf16>
    %cst_78 = arith.constant dense<0.000000e+00> : vector<1x128xf32>
    %198 = tpu.matmul %197, %79, %cst_78 {dimension_numbers = #tpu.dot_dimension_numbers<[1], [0], [0], [1], [0, 0, 1, 1], [], []>} : vector<1x32xbf16>, vector<32x128xbf16>, vector<1x128xf32> -> vector<1x128xf32>
    %199 = arith.addf %196, %198 : vector<1x128xf32>
    %200 = arith.negf %199 : vector<1x128xf32>
    %201 = math.exp %200 : vector<1x128xf32>
    %cst_79 = arith.constant 1.000000e+00 : f32
    %202 = vector.broadcast %cst_79 : f32 to vector<1x128xf32>
    %203 = arith.addf %202, %201 : vector<1x128xf32>
    %204 = arith.divf %202, %203 : vector<1x128xf32>
    %205 = math.tanh %199 : vector<1x128xf32>
    %206 = vector.extract_strided_slice %204 {offsets = [0, 0], sizes = [1, 32], strides = [1, 1]} : vector<1x128xf32> to vector<1x32xf32>
    %207 = vector.extract_strided_slice %204 {offsets = [0, 32], sizes = [1, 32], strides = [1, 1]} : vector<1x128xf32> to vector<1x32xf32>
    %208 = vector.extract_strided_slice %205 {offsets = [0, 64], sizes = [1, 32], strides = [1, 1]} : vector<1x128xf32> to vector<1x32xf32>
    %209 = vector.extract_strided_slice %204 {offsets = [0, 96], sizes = [1, 32], strides = [1, 1]} : vector<1x128xf32> to vector<1x32xf32>
    %210 = arith.mulf %207, %193 : vector<1x32xf32>
    %211 = arith.mulf %206, %208 : vector<1x32xf32>
    %212 = arith.addf %210, %211 : vector<1x32xf32>
    %213 = math.tanh %212 : vector<1x32xf32>
    %214 = arith.mulf %209, %213 : vector<1x32xf32>
    %215 = vector.extract_strided_slice %78 {offsets = [7, 0], sizes = [1, 128], strides = [1, 1]} : vector<8x128xf32> to vector<1x128xf32>
    %216 = arith.truncf %214 : vector<1x32xf32> to vector<1x32xbf16>
    %cst_80 = arith.constant dense<0.000000e+00> : vector<1x128xf32>
    %217 = tpu.matmul %216, %79, %cst_80 {dimension_numbers = #tpu.dot_dimension_numbers<[1], [0], [0], [1], [0, 0, 1, 1], [], []>} : vector<1x32xbf16>, vector<32x128xbf16>, vector<1x128xf32> -> vector<1x128xf32>
    %218 = arith.addf %215, %217 : vector<1x128xf32>
    %219 = arith.negf %218 : vector<1x128xf32>
    %220 = math.exp %219 : vector<1x128xf32>
    %cst_81 = arith.constant 1.000000e+00 : f32
    %221 = vector.broadcast %cst_81 : f32 to vector<1x128xf32>
    %222 = arith.addf %221, %220 : vector<1x128xf32>
    %223 = arith.divf %221, %222 : vector<1x128xf32>
    %224 = math.tanh %218 : vector<1x128xf32>
    %225 = vector.extract_strided_slice %223 {offsets = [0, 0], sizes = [1, 32], strides = [1, 1]} : vector<1x128xf32> to vector<1x32xf32>
    %226 = vector.extract_strided_slice %223 {offsets = [0, 32], sizes = [1, 32], strides = [1, 1]} : vector<1x128xf32> to vector<1x32xf32>
    %227 = vector.extract_strided_slice %224 {offsets = [0, 64], sizes = [1, 32], strides = [1, 1]} : vector<1x128xf32> to vector<1x32xf32>
    %228 = vector.extract_strided_slice %223 {offsets = [0, 96], sizes = [1, 32], strides = [1, 1]} : vector<1x128xf32> to vector<1x32xf32>
    %229 = arith.mulf %226, %212 : vector<1x32xf32>
    %230 = arith.mulf %225, %227 : vector<1x32xf32>
    %231 = arith.addf %229, %230 : vector<1x32xf32>
    %232 = math.tanh %231 : vector<1x32xf32>
    %233 = arith.mulf %228, %232 : vector<1x32xf32>
    %234 = arith.truncf %233 : vector<1x32xf32> to vector<1x32xbf16>
    %c0_82 = arith.constant 0 : index
    %c0_83 = arith.constant 0 : index
    %235 = vector.load %arg5[%c0_82, %c0_83] : memref<32x128xbf16, #tpu.memory_space<vmem>>, vector<32x128xbf16>
    %cst_84 = arith.constant dense<0.000000e+00> : vector<1x128xf32>
    %236 = tpu.matmul %234, %235, %cst_84 {dimension_numbers = #tpu.dot_dimension_numbers<[1], [0], [0], [1], [0, 0, 1, 1], [], []>} : vector<1x32xbf16>, vector<32x128xbf16>, vector<1x128xf32> -> vector<1x128xf32>
    %c0_85 = arith.constant 0 : index
    %c0_86 = arith.constant 0 : index
    %237 = vector.load %arg6[%c0_85, %c0_86] : memref<1x128xf32, #tpu.memory_space<vmem>>, vector<1x128xf32>
    %238 = arith.addf %236, %237 : vector<1x128xf32>
    %cst_87 = arith.constant dense<0xFF800000> : vector<1xf32>
    %239 = vector.multi_reduction <maximumf>, %238, %cst_87 [1] : vector<1x128xf32> to vector<1xf32>
    %240 = vector.shape_cast %239 : vector<1xf32> to vector<1x1xf32>
    %241 = vector.broadcast %240 : vector<1x1xf32> to vector<1x128xf32>
    %242 = arith.subf %238, %241 : vector<1x128xf32>
    %243 = math.exp %242 : vector<1x128xf32>
    %cst_88 = arith.constant dense<0.000000e+00> : vector<1xf32>
    %244 = vector.multi_reduction <add>, %243, %cst_88 [1] : vector<1x128xf32> to vector<1xf32>
    %245 = vector.shape_cast %244 : vector<1xf32> to vector<1x1xf32>
    %246 = math.log %245 : vector<1x1xf32>
    %247 = vector.broadcast %246 : vector<1x1xf32> to vector<1x128xf32>
    %248 = arith.subf %242, %247 : vector<1x128xf32>
    %c0_89 = arith.constant 0 : index
    %c0_90 = arith.constant 0 : index
    %249 = vector.load %arg7[%c0_89, %c0_90] : memref<1x128xf32, #tpu.memory_space<vmem>>, vector<1x128xf32>
    tpu.vector_store %arg7[%c0_89, %c0_90], %248 {strides = array<i32>} : memref<1x128xf32, #tpu.memory_space<vmem>>, vector<1x128xf32>,
    return
  }
}

</mosaic_0001>

<bundles_post_ra>
// kernel: tpu_custom_call.1
= control target key start
LH: loop header
LB: loop body
LE: loop exit
PB: predicated region body
PF: predicated region fallthrough
CT: control target
= control target key end

     0   :  { %12 = vsyncpa [#allocation7], 0  ;;  %s1989_s0 = inlined_call_operand.hbm [shape: s32[8], index: 0, kind: input, shape index: {}]   ;;  %s1990_s1 = inlined_call_operand.hbm [shape: f32[16,32], index: 1, kind: input, shape index: {}]   ;;  %s1991_s2 = inlined_call_operand.hbm [shape: bf16[32,128], index: 2, kind: input, shape index: {}]   ;;  %s1992_s3 = inlined_call_operand.hbm [shape: bf16[32,128], index: 3, kind: input, shape index: {}]   ;;  %s1993_s4 = inlined_call_operand.vmem [shape: f32[1,128], index: 4, kind: input, shape index: {}]   ;;  %s1994_s5 = inlined_call_operand.vmem [shape: bf16[32,128], index: 5, kind: input, shape index: {}]   ;;  %s1995_s6 = inlined_call_operand.vmem [shape: f32[1,128], index: 6, kind: input, shape index: {}]   ;;  %s1996_s7 = inlined_call_operand.hbm [shape: f32[1,128], index: 7, kind: output, shape index: {}]  }
   0x1   :  { %13 = vsyncpa [#allocation5], 0 }
   0x2   :  { %14 = vsyncpa [#allocation10], 0 }
   0x3   :  { %15 = vsyncpa [#allocation6], 0  ;;  %s1336_s26 = scalar_lea.hbm %s1989_s0, 16 }
   0x4   :  { %p1337_p0 = scmp.ne.s32.totalorder %s1989_s0, %s1336_s26  ;;  %p1340_p1 = scmp.lt.u32.totalorder %s1336_s26, %s1989_s0 }
   0x6   :  { %p1342_p2 = pnand %p1340_p1, %p1337_p0 }
   0x8   :  { %1345 = shalt.err (!%p1342_p2)
}
   0x9   :  { %s1628_s8 = smov [#allocation4]   ;;  %s1629_s11 = smov [#allocation8]  }
   0xa   :  { %23 = dma.hbm_to_smem %s1989_s0, 16, %s1628_s8, [#allocation7]  }
   0xb   :  { %s29_s12 = sshll.u32 %s1629_s11, 4  ;;  %s1346_s15 = scalar_lea.hbm %s1991_s2, 256  ;;  %s30_s12 = int_to_ptr.vmem [resolvable:$true] %s29_s12 }
   0xc   :  { %p1347_p3 = scmp.ne.s32.totalorder %s1991_s2, %s1346_s15  ;;  %p1350_p4 = scmp.lt.u32.totalorder %s1346_s15, %s1991_s2 }
   0xe   :  { %p1352_p5 = pnand %p1350_p4, %p1347_p3 }
  0x10   :  { %1355 = shalt.err (!%p1352_p5)
}
  0x11   :  { %s1356_s20 = scalar_lea.vmem %s30_s12, 256  ;;  %p1361_p7 = scmp.lt.s32.totalorder %s30_s12, %s30_s12 }
  0x12   :  { %p1357_p6 = scmp.ne.s32.totalorder %s30_s12, %s1356_s20  ;;  %p1362_p8 = scmp.lt.s32.totalorder %s1356_s20, %s1356_s20 }
  0x14   :  { %p1363_p9 = por %p1362_p8, %p1361_p7 }
  0x16   :  { %p1364_p10 = pnand %p1363_p9, %p1357_p6 }
  0x18   :  { %1367 = shalt.err (!%p1364_p10)
}
  0x19   :  { %s1630_s0 = smov 64   ;;  %s1631_s21 = smov 4  }
  0x1a   :  { %35 = dma.hbm_to_vmem [thread:$0]  %s1991_s2, 256, %s30_s12, [#allocation5], %s1630_s0, %s1630_s0, %s1631_s21  }
  0x1b   :  { %s1632_s24 = smov [#allocation9]   ;;  %s1368_s28 = scalar_lea.hbm %s1992_s3, 256 }
  0x1c   :  { %s41_s25 = sshll.u32 %s1632_s24, 4  ;;  %p1369_p11 = scmp.ne.s32.totalorder %s1992_s3, %s1368_s28  ;;  %s42_s25 = int_to_ptr.vmem [resolvable:$true] %s41_s25 }
  0x1d   :  { %p1372_p12 = scmp.lt.u32.totalorder %s1368_s28, %s1992_s3 }
  0x1f   :  { %p1374_p13 = pnand %p1372_p12, %p1369_p11 }
  0x21   :  { %1377 = shalt.err (!%p1374_p13)
}
  0x22   :  { %s1378_s10 = scalar_lea.vmem %s42_s25, 256  ;;  %p1383_p1 = scmp.lt.s32.totalorder %s42_s25, %s42_s25 }
  0x23   :  { %p1379_p0 = scmp.ne.s32.totalorder %s42_s25, %s1378_s10  ;;  %p1384_p2 = scmp.lt.s32.totalorder %s1378_s10, %s1378_s10 }
  0x25   :  { %p1385_p3 = por %p1384_p2, %p1383_p1 }
  0x27   :  { %p1386_p4 = pnand %p1385_p3, %p1379_p0 }
  0x29   :  { %1389 = shalt.err (!%p1386_p4)
}
  0x2a   :  { %47 = dma.hbm_to_vmem [thread:$0]  %s1992_s3, 256, %s42_s25, [#allocation10], %s1630_s0, %s1630_s0, %s1631_s21  }
  0x2b   :  { %1604 = dma.done.wait [#allocation7], 16  }
  0x2c   :  { %1605 = vsyncadd [#allocation7], 4294967280 }
  0x2d   :  { %1606 = dma.done.wait [#allocation5], 256  }
  0x2e   :  { %1607 = vsyncadd [#allocation5], 4294967040 }
  0x2f   :  { %1608 = dma.done.wait [#allocation10], 256  }
  0x30   :  { %1609 = vsyncadd [#allocation10], 4294967040 }
  0x31   :  { %63 = sfence }
  0x32   :  { %s65_s12 = sld [smem:[#allocation4]]  ;;  %s1633_s13 = smov [#allocation2]  }
  0x33   :  { %s75_s14 = sshll.u32 %s1633_s13, 4  ;;  %s1726_s15 = sld [smem:[#allocation4 + $0x1]]  ;;  %s1728_s14 = int_to_ptr.vmem [resolvable:$true] %s75_s14 }
  0x34   :  { %s1634_s16 = smov [#allocation2 + $0x1]   ;;  %s1730_s18 = sld [smem:[#allocation4 + $0x2]] }
  0x35   :  { %s91_s17 = sshll.u32 %s1634_s16, 4  ;;  %s1635_s3 = smov [#allocation2 + $0x2]   ;;  %s1732_s17 = int_to_ptr.vmem [resolvable:$true] %s91_s17 }
  0x36   :  { %s107_s19 = sshll.u32 %s1635_s3, 4  ;;  %s1734_s20 = sld [smem:[#allocation4 + $0x3]]  ;;  %s1736_s19 = int_to_ptr.vmem [resolvable:$true] %s107_s19 }
  0x37   :  { %s1745_s29 = scalar_lea.hbm %s1990_s1, 256 }
  0x38   :  { %s1087_s21 = sshll.u32 %s65_s12, 4 }
  0x39   :  { %s67_s24 = scalar_lea.hbm %s1990_s1, %s1087_s21  ;;  %s1089_s25 = sshll.u32 %s1726_s15, 4 }
  0x3a   :  { %s1390_s26 = scalar_lea.hbm %s67_s24, 16  ;;  %p1393_p6 = scmp.lt.u32.totalorder %s67_s24, %s1990_s1 }
  0x3b   :  { %p1391_p5 = scmp.ne.s32.totalorder %s67_s24, %s1390_s26  ;;  %p1394_p7 = scmp.lt.u32.totalorder %s1745_s29, %s1390_s26 }
  0x3c   :  { %p1396_p9 = scmp.lt.u32.totalorder %s1390_s26, %s67_s24 }
  0x3d   :  { %p1395_p8 = por %p1394_p7, %p1393_p6 }
  0x3f   :  { %p1397_p10 = por %p1396_p9, %p1395_p8 }
  0x41   :  { %p1398_p11 = pnand %p1397_p10, %p1391_p5 }
  0x43   :  { %1401 = shalt.err (!%p1398_p11)  }
  0x44   :  { %s1402_s9 = scalar_lea.vmem %s1728_s14, 16  ;;  %s1754_s10 = scalar_lea.vmem %s1728_s14, 128 }
  0x45   :  { %p1403_p12 = scmp.ne.s32.totalorder %s1728_s14, %s1402_s9  ;;  %p1407_p13 = scmp.lt.s32.totalorder %s1728_s14, %s1728_s14 }
  0x46   :  { %p1408_p0 = scmp.lt.s32.totalorder %s1754_s10, %s1402_s9 }
  0x48   :  { %p1409_p1 = por %p1408_p0, %p1407_p13 }
  0x4a   :  { %p1410_p2 = pnand %p1409_p1, %p1403_p12 }
  0x4c   :  { %1413 = shalt.err (!%p1410_p2)  }
  0x4d   :  { %78 = dma.hbm_to_vmem [thread:$0]  %s67_s24, 16, %s1728_s14, [#allocation3] }
  0x4e   :  { %s81_s12 = scalar_lea.hbm %s1990_s1, %s1089_s25  ;;  %s1091_s13 = sshll.u32 %s1730_s18, 4 }
  0x4f   :  { %s1414_s15 = scalar_lea.hbm %s81_s12, 16  ;;  %p1417_p4 = scmp.lt.u32.totalorder %s81_s12, %s1990_s1 }
  0x50   :  { %p1415_p3 = scmp.ne.s32.totalorder %s81_s12, %s1414_s15  ;;  %p1418_p5 = scmp.lt.u32.totalorder %s1745_s29, %s1414_s15 }
  0x51   :  { %p1420_p7 = scmp.lt.u32.totalorder %s1414_s15, %s81_s12 }
  0x52   :  { %p1419_p6 = por %p1418_p5, %p1417_p4 }
  0x54   :  { %p1421_p8 = por %p1420_p7, %p1419_p6 }
  0x56   :  { %p1422_p9 = pnand %p1421_p8, %p1415_p3 }
  0x58   :  { %1425 = shalt.err (!%p1422_p9)  }
  0x59   :  { %s1426_s21 = scalar_lea.vmem %s1732_s17, 16  ;;  %p1431_p11 = scmp.lt.s32.totalorder %s1732_s17, %s1728_s14 }
  0x5a   :  { %p1427_p10 = scmp.ne.s32.totalorder %s1732_s17, %s1426_s21  ;;  %p1432_p12 = scmp.lt.s32.totalorder %s1754_s10, %s1426_s21 }
  0x5c   :  { %p1433_p13 = por %p1432_p12, %p1431_p11 }
  0x5e   :  { %p1434_p0 = pnand %p1433_p13, %p1427_p10 }
  0x60   :  { %1437 = shalt.err (!%p1434_p0)  }
  0x61   :  { %94 = dma.hbm_to_vmem [thread:$0]  %s81_s12, 16, %s1732_s17, [#allocation3 + $0x1] }
  0x62   :  { %s97_s23 = scalar_lea.hbm %s1990_s1, %s1091_s13  ;;  %s1093_s24 = sshll.u32 %s1734_s20, 4 }
  0x63   :  { %s1438_s25 = scalar_lea.hbm %s97_s23, 16  ;;  %p1441_p2 = scmp.lt.u32.totalorder %s97_s23, %s1990_s1 }
  0x64   :  { %p1439_p1 = scmp.ne.s32.totalorder %s97_s23, %s1438_s25  ;;  %p1442_p3 = scmp.lt.u32.totalorder %s1745_s29, %s1438_s25 }
  0x65   :  { %p1444_p5 = scmp.lt.u32.totalorder %s1438_s25, %s97_s23 }
  0x66   :  { %p1443_p4 = por %p1442_p3, %p1441_p2 }
  0x68   :  { %p1445_p6 = por %p1444_p5, %p1443_p4 }
  0x6a   :  { %p1446_p7 = pnand %p1445_p6, %p1439_p1 }
  0x6c   :  { %1449 = shalt.err (!%p1446_p7)  }
  0x6d   :  { %s1450_s17 = scalar_lea.vmem %s1736_s19, 16  ;;  %p1455_p9 = scmp.lt.s32.totalorder %s1736_s19, %s1728_s14 }
  0x6e   :  { %p1451_p8 = scmp.ne.s32.totalorder %s1736_s19, %s1450_s17  ;;  %p1456_p10 = scmp.lt.s32.totalorder %s1754_s10, %s1450_s17 }
  0x70   :  { %p1457_p11 = por %p1456_p10, %p1455_p9 }
  0x72   :  { %p1458_p12 = pnand %p1457_p11, %p1451_p8 }
  0x74   :  { %1461 = shalt.err (!%p1458_p12)  }
  0x75   :  { %110 = dma.hbm_to_vmem [thread:$0]  %s97_s23, 16, %s1736_s19, [#allocation3 + $0x2] }
  0x76   :  { %s113_s30 = scalar_lea.hbm %s1990_s1, %s1093_s24  ;;  %s1636_s8 = smov [#allocation2 + $0x3]  }
  0x77   :  { %s123_s9 = sshll.u32 %s1636_s8, 4  ;;  %s1791_s2 = sld [smem:[#allocation4 + $0x4]]  ;;  %s124_s9 = int_to_ptr.vmem [resolvable:$true] %s123_s9 }
  0x78   :  { %s1462_s11 = scalar_lea.hbm %s113_s30, 16  ;;  %p1465_p0 = scmp.lt.u32.totalorder %s113_s30, %s1990_s1 }
  0x79   :  { %p1463_p13 = scmp.ne.s32.totalorder %s113_s30, %s1462_s11  ;;  %p1466_p1 = scmp.lt.u32.totalorder %s1745_s29, %s1462_s11 }
  0x7a   :  { %p1468_p3 = scmp.lt.u32.totalorder %s1462_s11, %s113_s30 }
  0x7b   :  { %p1467_p2 = por %p1466_p1, %p1465_p0 }
  0x7d   :  { %p1469_p4 = por %p1468_p3, %p1467_p2 }
  0x7f   :  { %p1470_p5 = pnand %p1469_p4, %p1463_p13 }
  0x81   :  { %1473 = shalt.err (!%p1470_p5)  }
  0x82   :  { %s1474_s19 = scalar_lea.vmem %s124_s9, 16  ;;  %p1479_p7 = scmp.lt.s32.totalorder %s124_s9, %s1728_s14 }
  0x83   :  { %p1475_p6 = scmp.ne.s32.totalorder %s124_s9, %s1474_s19  ;;  %p1480_p8 = scmp.lt.s32.totalorder %s1754_s10, %s1474_s19 }
  0x85   :  { %p1481_p9 = por %p1480_p8, %p1479_p7 }
  0x87   :  { %p1482_p10 = pnand %p1481_p9, %p1475_p6 }
  0x89   :  { %1485 = shalt.err (!%p1482_p10)  }
  0x8a   :  { %126 = dma.hbm_to_vmem [thread:$0]  %s113_s30, 16, %s124_s9, [#allocation3 + $0x3] }
  0x8b   :  { %s1637_s15 = smov [#allocation2 + $0x4]   ;;  %s1799_s3 = sld [smem:[#allocation4 + $0x5]] }
  0x8c   :  { %s139_s16 = sshll.u32 %s1637_s15, 4  ;;  %s1638_s21 = smov [#allocation2 + $0x5]   ;;  %s140_s16 = int_to_ptr.vmem [resolvable:$true] %s139_s16 }
  0x8d   :  { %s155_s18 = sshll.u32 %s1638_s21, 4  ;;  %s1801_s22 = sld [smem:[#allocation4 + $0x6]]  ;;  %s1804_s18 = int_to_ptr.vmem [resolvable:$true] %s155_s18 }
  0x8e   :  { %s1095_s23 = sshll.u32 %s1791_s2, 4 }
  0x8f   :  { %s129_s26 = scalar_lea.hbm %s1990_s1, %s1095_s23 }
  0x90   :  { %s1486_s27 = scalar_lea.hbm %s129_s26, 16  ;;  %p1489_p12 = scmp.lt.u32.totalorder %s129_s26, %s1990_s1 }
  0x91   :  { %p1487_p11 = scmp.ne.s32.totalorder %s129_s26, %s1486_s27  ;;  %p1490_p13 = scmp.lt.u32.totalorder %s1745_s29, %s1486_s27 }
  0x92   :  { %p1492_p1 = scmp.lt.u32.totalorder %s1486_s27, %s129_s26 }
  0x93   :  { %p1491_p0 = por %p1490_p13, %p1489_p12 }
  0x95   :  { %p1493_p2 = por %p1492_p1, %p1491_p0 }
  0x97   :  { %p1494_p3 = pnand %p1493_p2, %p1487_p11 }
  0x99   :  { %1497 = shalt.err (!%p1494_p3)  }
  0x9a   :  { %s1498_s28 = scalar_lea.vmem %s140_s16, 16  ;;  %p1503_p5 = scmp.lt.s32.totalorder %s140_s16, %s1728_s14 }
  0x9b   :  { %p1499_p4 = scmp.ne.s32.totalorder %s140_s16, %s1498_s28  ;;  %p1504_p6 = scmp.lt.s32.totalorder %s1754_s10, %s1498_s28 }
  0x9d   :  { %p1505_p7 = por %p1504_p6, %p1503_p5 }
  0x9f   :  { %p1506_p8 = pnand %p1505_p7, %p1499_p4 }
  0xa1   :  { %1509 = shalt.err (!%p1506_p8)  }
  0xa2   :  { %142 = dma.hbm_to_vmem [thread:$0]  %s129_s26, 16, %s140_s16, [#allocation3 + $0x4] }
  0xa3   :  { %s1097_s30 = sshll.u32 %s1799_s3, 4  ;;  %s1639_s8 = smov [#allocation2 + $0x6]  }
  0xa4   :  { %s171_s9 = sshll.u32 %s1639_s8, 4  ;;  %s145_s12 = scalar_lea.hbm %s1990_s1, %s1097_s30  ;;  %s1819_s9 = int_to_ptr.vmem [resolvable:$true] %s171_s9 }
  0xa5   :  { %s1510_s13 = scalar_lea.hbm %s145_s12, 16  ;;  %p1513_p10 = scmp.lt.u32.totalorder %s145_s12, %s1990_s1 }
  0xa6   :  { %p1511_p9 = scmp.ne.s32.totalorder %s145_s12, %s1510_s13  ;;  %p1514_p11 = scmp.lt.u32.totalorder %s1745_s29, %s1510_s13 }
  0xa7   :  { %p1516_p13 = scmp.lt.u32.totalorder %s1510_s13, %s145_s12 }
  0xa8   :  { %p1515_p12 = por %p1514_p11, %p1513_p10 }
  0xaa   :  { %p1517_p0 = por %p1516_p13, %p1515_p12 }
  0xac   :  { %p1518_p1 = pnand %p1517_p0, %p1511_p9 }
  0xae   :  { %1521 = shalt.err (!%p1518_p1)  }
  0xaf   :  { %s1522_s16 = scalar_lea.vmem %s1804_s18, 16  ;;  %p1527_p3 = scmp.lt.s32.totalorder %s1804_s18, %s1728_s14 }
  0xb0   :  { %p1523_p2 = scmp.ne.s32.totalorder %s1804_s18, %s1522_s16  ;;  %p1528_p4 = scmp.lt.s32.totalorder %s1754_s10, %s1522_s16 }
  0xb2   :  { %p1529_p5 = por %p1528_p4, %p1527_p3 }
  0xb4   :  { %p1530_p6 = pnand %p1529_p5, %p1523_p2 }
  0xb6   :  { %1533 = shalt.err (!%p1530_p6)  }
  0xb7   :  { %158 = dma.hbm_to_vmem [thread:$0]  %s145_s12, 16, %s1804_s18, [#allocation3 + $0x5] }
  0xb8   :  { %s1099_s3 = sshll.u32 %s1801_s22, 4  ;;  %s1100_s21 = sld [smem:[#allocation4 + $0x7]] }
  0xb9   :  { %s161_s25 = scalar_lea.hbm %s1990_s1, %s1099_s3 }
  0xba   :  { %s1534_s26 = scalar_lea.hbm %s161_s25, 16  ;;  %p1537_p8 = scmp.lt.u32.totalorder %s161_s25, %s1990_s1 }
  0xbb   :  { %p1535_p7 = scmp.ne.s32.totalorder %s161_s25, %s1534_s26  ;;  %p1538_p9 = scmp.lt.u32.totalorder %s1745_s29, %s1534_s26 }
  0xbc   :  { %p1540_p11 = scmp.lt.u32.totalorder %s1534_s26, %s161_s25 }
  0xbd   :  { %p1539_p10 = por %p1538_p9, %p1537_p8 }
  0xbf   :  { %p1541_p12 = por %p1540_p11, %p1539_p10 }
  0xc1   :  { %p1542_p13 = pnand %p1541_p12, %p1535_p7 }
  0xc3   :  { %1545 = shalt.err (!%p1542_p13)  }
  0xc4   :  { %s1546_s18 = scalar_lea.vmem %s1819_s9, 16  ;;  %p1551_p1 = scmp.lt.s32.totalorder %s1819_s9, %s1728_s14 }
  0xc5   :  { %p1547_p0 = scmp.ne.s32.totalorder %s1819_s9, %s1546_s18  ;;  %p1552_p2 = scmp.lt.s32.totalorder %s1754_s10, %s1546_s18 }
  0xc7   :  { %p1553_p3 = por %p1552_p2, %p1551_p1 }
  0xc9   :  { %p1554_p4 = pnand %p1553_p3, %p1547_p0 }
  0xcb   :  { %1557 = shalt.err (!%p1554_p4)  }
  0xcc   :  { %174 = dma.hbm_to_vmem [thread:$0]  %s161_s25, 16, %s1819_s9, [#allocation3 + $0x6] }
  0xcd   :  { %s1640_s22 = smov [#allocation2 + $0x7]   ;;  %s1101_s28 = sshll.u32 %s1100_s21, 4 }
  0xce   :  { %s187_s20 = sshll.u32 %s1640_s22, 4  ;;  %s177_s2 = scalar_lea.hbm %s1990_s1, %s1101_s28  ;;  %s188_s20 = int_to_ptr.vmem [resolvable:$true] %s187_s20 }
  0xcf   :  { %s1558_s11 = scalar_lea.hbm %s177_s2, 16  ;;  %p1561_p6 = scmp.lt.u32.totalorder %s177_s2, %s1990_s1 }
  0xd0   :  { %p1559_p5 = scmp.ne.s32.totalorder %s177_s2, %s1558_s11  ;;  %p1562_p7 = scmp.lt.u32.totalorder %s1745_s29, %s1558_s11 }
  0xd1   :  { %p1564_p9 = scmp.lt.u32.totalorder %s1558_s11, %s177_s2 }
  0xd2   :  { %p1563_p8 = por %p1562_p7, %p1561_p6 }
  0xd4   :  { %p1565_p10 = por %p1564_p9, %p1563_p8 }
  0xd6   :  { %p1566_p11 = pnand %p1565_p10, %p1559_p5 }
  0xd8   :  { %1569 = shalt.err (!%p1566_p11)  }
  0xd9   :  { %s1570_s9 = scalar_lea.vmem %s188_s20, 16  ;;  %p1575_p13 = scmp.lt.s32.totalorder %s188_s20, %s1728_s14 }
  0xda   :  { %p1571_p12 = scmp.ne.s32.totalorder %s188_s20, %s1570_s9  ;;  %p1576_p0 = scmp.lt.s32.totalorder %s1754_s10, %s1570_s9 }
  0xdc   :  { %p1577_p1 = por %p1576_p0, %p1575_p13 }
  0xde   :  { %p1578_p2 = pnand %p1577_p1, %p1571_p12 }
  0xe0   :  { %1581 = shalt.err (!%p1578_p2)  }
  0xe1   :  { %190 = dma.hbm_to_vmem [thread:$0]  %s177_s2, 16, %s188_s20, [#allocation3 + $0x7] }
  0xe2   :  { %1610 = dma.done.wait [#allocation3], 16 }
  0xe3   :  { %1611 = vsyncadd [#allocation3], 4294967280 }
  0xe4   :  { %1612 = dma.done.wait [#allocation3 + $0x1], 16 }
  0xe5   :  { %1613 = vsyncadd [#allocation3 + $0x1], 4294967280 }
  0xe6   :  { %1614 = dma.done.wait [#allocation3 + $0x2], 16 }
  0xe7   :  { %1615 = vsyncadd [#allocation3 + $0x2], 4294967280 }
  0xe8   :  { %1616 = dma.done.wait [#allocation3 + $0x3], 16 }
  0xe9   :  { %1617 = vsyncadd [#allocation3 + $0x3], 4294967280 }
  0xea   :  { %1618 = dma.done.wait [#allocation3 + $0x4], 16 }
  0xeb   :  { %1619 = vsyncadd [#allocation3 + $0x4], 4294967280 }
  0xec   :  { %1620 = dma.done.wait [#allocation3 + $0x5], 16 }
  0xed   :  { %1621 = vsyncadd [#allocation3 + $0x5], 4294967280 }
  0xee   :  { %1622 = dma.done.wait [#allocation3 + $0x6], 16 }
  0xef   :  { %1623 = vsyncadd [#allocation3 + $0x6], 4294967280 }
  0xf0   :  { %1624 = dma.done.wait [#allocation3 + $0x7], 16 }
  0xf1   :  { %1625 = vsyncadd [#allocation3 + $0x7], 4294967280  ;;  %v1641_v0 = vmov 0.0   ;;  %vm1642_vm0 = vmmov 0   ;;  %v1262_v1 = vld [vmem:[#allocation8] sm:$0xff]   ;;  %v1860_v2 = vld [vmem:[#allocation9] sm:$0xff]  }
  0xf2   :  { %1164 = vmatprep.subr.bf16.mxu0 %v1641_v0  ;;  %1172 = vmatprep.subr.bf16.mxu1 %v1641_v0  ;;  %v1264_v3 = vld [vmem:[#allocation8 + $0x8] sm:$0xff]   ;;  %v1864_v4 = vld [vmem:[#allocation9 + $0x8] sm:$0xff]   ;;  %vm233_vm1 = vcmask 261120   ;;  %v1643_v7 = vmov 0   ;;  %vm985_vm2 = vcmask 1040384  }
  0xf3   :  { %1168 = vmatprep.mubr.msk.bf16.mxu0 %vm1642_vm0, %v1641_v0  ;;  %1176 = vmatprep.mubr.msk.bf16.mxu1 %vm1642_vm0, %v1641_v0  ;;  %v208_v5 = vld [vmem:[#allocation2] sm:$0xff]  ;;  %v1102_v8 = vld [vmem:[%s1993_s4] ss:$0 sm:$0xff]  ;;  %s1644_s4 = smov 32  }
  0xf4   :  { %1165 = vmatpush3.bf16.msra.mxu0 %v1262_v1  ;;  %1173 = vmatpush3.bf16.msra.mxu1 %v1860_v2  ;;  %v209_v6 = vpack.c.bf16 %v208_v5, %v208_v5 }
  0xf5   :  { %1166 = vmatprep.subr.bf16.mxu0 %v1641_v0  ;;  %1174 = vmatprep.subr.bf16.mxu1 %v1641_v0 }
  0xf8   :  { %1167 = vmatpush3.bf16.msra.mxu0 %v1264_v3  ;;  %1175 = vmatpush3.bf16.msra.mxu1 %v1864_v4 }
  0xf9   :  { %1180 = vmatprep.subr.bf16.mxu0 %v1641_v0  ;;  %1188 = vmatprep.subr.bf16.mxu1 %v1641_v0 }
  0xfb   :  { %1169 = vmatmul.mubr.msk.bf16.vlgmr.msra.gmra.mrb[0].mxu0 %vm233_vm1, %v209_v6  ;;  %1177 = vmatmul.mubr.bf16.vlgmr.msra.gmra.mrb[0].mxu1 %v1643_v7 }
  0xfc   :  { %1181 = vmatpush3.bf16.msra.mxu0 %v1860_v2  ;;  %1184 = vmatprep.mubr.msk.bf16.mxu0 %vm1642_vm0, %v1641_v0 }
  0xfd   :  { %1182 = vmatprep.subr.bf16.mxu0 %v1641_v0  ;;  %1189 = vmatpush3.bf16.msra.mxu1 %v1860_v2 }
  0xfe   :  { %1192 = vmatprep.mubr.msk.bf16.mxu1 %vm1642_vm0, %v1641_v0  ;;  %1190 = vmatprep.subr.bf16.mxu1 %v1641_v0 }
 0x100   :  { %1183 = vmatpush3.bf16.msra.mxu0 %v1864_v4 }
 0x101   :  { %1196 = vmatprep.subr.bf16.mxu0 %v1641_v0  ;;  %1191 = vmatpush3.bf16.msra.mxu1 %v1864_v4 }
 0x102   :  { %1204 = vmatprep.subr.bf16.mxu1 %v1641_v0 }
 0x1ce   :  { %v271_v9 = vpop.f32.mrb[0].mxu0  ;;  %v330_v11 = vpop.f32.mrb[0].mxu1 }
 0x1cf   :  { %v1886_v10 = vadd.f32 %v1102_v8, %v271_v9  ;;  %v1170_v12 = vpop.f32.mrb[1].mxu0  ;;  %v1178_v13 = vpop.f32.mrb[1].mxu1 }
 0x1d0   :  { %v274_v14 = vpop.f32.mrb[2].mxu0  ;;  %v333_v16 = vpop.f32.mrb[2].mxu1 }
 0x1d1   :  { %v336_v15 = vadd.f32 %v330_v11, %v1886_v10  ;;  %v1171_v17 = vpop.f32.mrb[3].mxu0  ;;  %v1179_v18 = vpop.f32.mrb[3].mxu1 }
 0x1d3   :  { %1268 = vtanh.f32 %v336_v15  ;;  %v1108_v20 = vmul.f32 -1.442695, %v336_v15 }
 0x1d5   :  { %1270 = vpow2.f32 %v1108_v20 }
 0x1dd   :  { %v1269_v19 = vpop.eup %1268 }
 0x1de   :  { %346 = vrot.lane.b32.xlu0 %v1269_v19, %s1630_s0 }
 0x1df   :  { %v1271_v21 = vpop.eup %1270 }
 0x1e0   :  { %v340_v22 = vadd.f32 1.0, %v1271_v21 }
 0x1e2   :  { %1272 = vrcp.f32 %v340_v22 }
 0x1ec   :  { %v1273_v23 = vpop.eup %1272 }
 0x1ed   :  { %v344_v26 = vmul.f32 0.0, %v1273_v23 }
 0x250   :  { %v347_v24 = vpop.permute.xlu0 %346 }
 0x251   :  { %v349_v25 = vmul.f32 %v1273_v23, %v347_v24 }
 0x253   :  { %351 = vrot.lane.b32.xlu0 %v349_v25, %s1644_s4 }
 0x2c5   :  { %v352_v27 = vpop.permute.xlu0 %351 }
 0x2c6   :  { %v354_v28 = vadd.f32 %v352_v27, %v344_v26 }
 0x2c8   :  { %1274 = vtanh.f32 %v354_v28  ;;  %v420_v47 = vrot.slane %v354_v28, 7 }
 0x2d2   :  { %v1275_v29 = vpop.eup %1274 }
 0x2d3   :  { %357 = vrot.lane.b32.xlu1 %v1275_v29, %s1630_s0 }
 0x345   :  { %v358_v30 = vpop.permute.xlu1 %357 }
 0x346   :  { %v360_v31 = vmul.f32 %v1273_v23, %v358_v30 }
 0x348   :  { %v361_v32 = vpack.c.bf16 %v360_v31, %v360_v31 }
 0x34a   :  { %363 = vrot.lane.b32.xlu1 %v361_v32, %s1644_s4 }
 0x3bc   :  { %v364_v33 = vpop.permute.xlu1 %363 }
 0x3bd   :  { %1185 = vmatmul.mubr.msk.bf16.vlgmr.msra.gmra.mrb[4].mxu0 %vm233_vm1, %v364_v33 }
 0x3be   :  { %1197 = vmatpush3.bf16.msra.mxu0 %v1860_v2  ;;  %1200 = vmatprep.mubr.msk.bf16.mxu0 %vm1642_vm0, %v1641_v0 }
 0x3bf   :  { %1198 = vmatprep.subr.bf16.mxu0 %v1641_v0 }
 0x3c2   :  { %1199 = vmatpush3.bf16.msra.mxu0 %v1864_v4 }
 0x3c3   :  { %1212 = vmatprep.subr.bf16.mxu0 %v1641_v0 }
 0x490   :  { %v402_v34 = vpop.f32.mrb[4].mxu0 }
 0x491   :  { %v409_v35 = vrot.slane %v402_v34, 7  ;;  %v1186_v36 = vpop.f32.mrb[5].mxu0 }
 0x492   :  { %v405_v37 = vpop.f32.mrb[6].mxu0 }
 0x493   :  { %v411_v38 = vadd.f32 %v409_v35, %v1886_v10  ;;  %v1187_v39 = vpop.f32.mrb[7].mxu0 }
 0x495   :  { %1276 = vtanh.f32 %v411_v38  ;;  %v1110_v41 = vmul.f32 -1.442695, %v411_v38 }
 0x497   :  { %1278 = vpow2.f32 %v1110_v41 }
 0x49f   :  { %v1277_v40 = vpop.eup %1276 }
 0x4a0   :  { %424 = vrot.lane.b32.xlu0 %v1277_v40, %s1630_s0 }
 0x4a1   :  { %v1279_v42 = vpop.eup %1278 }
 0x4a2   :  { %v415_v43 = vadd.f32 1.0, %v1279_v42 }
 0x4a4   :  { %1280 = vrcp.f32 %v415_v43 }
 0x4ae   :  { %v1281_v44 = vpop.eup %1280 }
 0x4af   :  { %v422_v48 = vmul.f32 %v1281_v44, %v420_v47 }
 0x512   :  { %v425_v45 = vpop.permute.xlu0 %424 }
 0x513   :  { %v427_v46 = vmul.f32 %v1281_v44, %v425_v45 }
 0x515   :  { %429 = vrot.lane.b32.xlu1 %v427_v46, %s1644_s4 }
 0x587   :  { %v430_v49 = vpop.permute.xlu1 %429 }
 0x588   :  { %v432_v50 = vadd.f32 %v430_v49, %v422_v48 }
 0x58a   :  { %1282 = vtanh.f32 %v432_v50  ;;  %v500_v9 = vrot.slane %v432_v50, 7 }
 0x594   :  { %v1283_v51 = vpop.eup %1282 }
 0x595   :  { %435 = vrot.lane.b32.xlu0 %v1283_v51, %s1630_s0 }
 0x607   :  { %v436_v52 = vpop.permute.xlu0 %435 }
 0x608   :  { %v438_v53 = vmul.f32 %v1281_v44, %v436_v52 }
 0x60a   :  { %v439_v54 = vpack.c.bf16 %v438_v53, %v438_v53 }
 0x60c   :  { %v441_v55 = vshrl.u32 %v439_v54, 16 }
 0x60e   :  { %443 = vrot.lane.b32.xlu1 %v441_v55, %s1644_s4 }
 0x680   :  { %v444_v56 = vpop.permute.xlu1 %443 }
 0x681   :  { %1193 = vmatmul.mubr.msk.bf16.vlgmr.msra.gmra.mrb[4].mxu1 %vm233_vm1, %v444_v56 }
 0x682   :  { %1205 = vmatpush3.bf16.msra.mxu1 %v1860_v2  ;;  %1208 = vmatprep.mubr.msk.bf16.mxu1 %vm1642_vm0, %v1641_v0 }
 0x683   :  { %1206 = vmatprep.subr.bf16.mxu1 %v1641_v0 }
 0x686   :  { %1207 = vmatpush3.bf16.msra.mxu1 %v1864_v4 }
 0x687   :  { %1220 = vmatprep.subr.bf16.mxu1 %v1641_v0 }
 0x754   :  { %v482_v57 = vpop.f32.mrb[4].mxu1 }
 0x755   :  { %v489_v58 = vrot.slane %v482_v57, 6  ;;  %v1194_v59 = vpop.f32.mrb[5].mxu1 }
 0x756   :  { %v485_v60 = vpop.f32.mrb[6].mxu1 }
 0x757   :  { %v491_v61 = vadd.f32 %v489_v58, %v1886_v10  ;;  %v1195_v62 = vpop.f32.mrb[7].mxu1 }
 0x759   :  { %1284 = vtanh.f32 %v491_v61  ;;  %v1112_v1 = vmul.f32 -1.442695, %v491_v61 }
 0x75b   :  { %1286 = vpow2.f32 %v1112_v1 }
 0x763   :  { %v1285_v63 = vpop.eup %1284 }
 0x764   :  { %504 = vrot.lane.b32.xlu0 %v1285_v63, %s1630_s0 }
 0x765   :  { %v1287_v3 = vpop.eup %1286 }
 0x766   :  { %v495_v5 = vadd.f32 1.0, %v1287_v3 }
 0x768   :  { %1288 = vrcp.f32 %v495_v5 }
 0x772   :  { %v1289_v6 = vpop.eup %1288 }
 0x773   :  { %v502_v11 = vmul.f32 %v1289_v6, %v500_v9 }
 0x7d6   :  { %v505_v7 = vpop.permute.xlu0 %504 }
 0x7d7   :  { %v507_v8 = vmul.f32 %v1289_v6, %v505_v7 }
 0x7d9   :  { %509 = vrot.lane.b32.xlu1 %v507_v8, %s1644_s4 }
 0x84b   :  { %v510_v12 = vpop.permute.xlu1 %509 }
 0x84c   :  { %v512_v13 = vadd.f32 %v510_v12, %v502_v11 }
 0x84e   :  { %1290 = vtanh.f32 %v512_v13  ;;  %v579_v33 = vrot.slane %v512_v13, 7 }
 0x858   :  { %v1291_v14 = vpop.eup %1290 }
 0x859   :  { %515 = vrot.lane.b32.xlu0 %v1291_v14, %s1630_s0 }
 0x8cb   :  { %v516_v15 = vpop.permute.xlu0 %515 }
 0x8cc   :  { %v518_v16 = vmul.f32 %v1289_v6, %v516_v15 }
 0x8ce   :  { %v519_v17 = vpack.c.bf16 %v518_v16, %v518_v16 }
 0x8d0   :  { %v521_v18 = vrot.slane %v519_v17, 1 }
 0x8d2   :  { %522 = vrot.lane.b32.xlu1 %v521_v18, %s1644_s4 }
 0x944   :  { %v523_v19 = vpop.permute.xlu1 %522 }
 0x945   :  { %1201 = vmatmul.mubr.msk.bf16.vlgmr.msra.gmra.mrb[8].mxu0 %vm233_vm1, %v523_v19 }
 0x946   :  { %1213 = vmatpush3.bf16.msra.mxu0 %v1860_v2  ;;  %1216 = vmatprep.mubr.msk.bf16.mxu0 %vm1642_vm0, %v1641_v0 }
 0x947   :  { %1214 = vmatprep.subr.bf16.mxu0 %v1641_v0 }
 0x94a   :  { %1215 = vmatpush3.bf16.msra.mxu0 %v1864_v4 }
 0x94b   :  { %1228 = vmatprep.subr.bf16.mxu0 %v1641_v0 }
 0xa18   :  { %v561_v20 = vpop.f32.mrb[8].mxu0 }
 0xa19   :  { %v568_v21 = vrot.slane %v561_v20, 5  ;;  %v1202_v22 = vpop.f32.mrb[9].mxu0 }
 0xa1a   :  { %v564_v23 = vpop.f32.mrb[10].mxu0 }
 0xa1b   :  { %v570_v24 = vadd.f32 %v568_v21, %v1886_v10  ;;  %v1203_v25 = vpop.f32.mrb[11].mxu0 }
 0xa1d   :  { %1292 = vtanh.f32 %v570_v24  ;;  %v1114_v27 = vmul.f32 -1.442695, %v570_v24 }
 0xa1f   :  { %1294 = vpow2.f32 %v1114_v27 }
 0xa27   :  { %v1293_v26 = vpop.eup %1292 }
 0xa28   :  { %583 = vrot.lane.b32.xlu0 %v1293_v26, %s1630_s0 }
 0xa29   :  { %v1295_v28 = vpop.eup %1294 }
 0xa2a   :  { %v574_v29 = vadd.f32 1.0, %v1295_v28 }
 0xa2c   :  { %1296 = vrcp.f32 %v574_v29 }
 0xa36   :  { %v1297_v30 = vpop.eup %1296 }
 0xa37   :  { %v581_v34 = vmul.f32 %v1297_v30, %v579_v33 }
 0xa9a   :  { %v584_v31 = vpop.permute.xlu0 %583 }
 0xa9b   :  { %v586_v32 = vmul.f32 %v1297_v30, %v584_v31 }
 0xa9d   :  { %588 = vrot.lane.b32.xlu1 %v586_v32, %s1644_s4 }
 0xb0f   :  { %v589_v35 = vpop.permute.xlu1 %588 }
 0xb10   :  { %v591_v36 = vadd.f32 %v589_v35, %v581_v34 }
 0xb12   :  { %1298 = vtanh.f32 %v591_v36  ;;  %v660_v57 = vrot.slane %v591_v36, 7 }
 0xb1c   :  { %v1299_v37 = vpop.eup %1298 }
 0xb1d   :  { %594 = vrot.lane.b32.xlu0 %v1299_v37, %s1630_s0 }
 0xb8f   :  { %v595_v38 = vpop.permute.xlu0 %594 }
 0xb90   :  { %v597_v39 = vmul.f32 %v1297_v30, %v595_v38 }
 0xb92   :  { %v598_v40 = vpack.c.bf16 %v597_v39, %v597_v39 }
 0xb94   :  { %v600_v41 = vshrl.u32 %v598_v40, 16 }
 0xb96   :  { %v602_v42 = vrot.slane %v600_v41, 1 }
 0xb98   :  { %603 = vrot.lane.b32.xlu1 %v602_v42, %s1644_s4 }
 0xc0a   :  { %v604_v43 = vpop.permute.xlu1 %603 }
 0xc0b   :  { %1209 = vmatmul.mubr.msk.bf16.vlgmr.msra.gmra.mrb[8].mxu1 %vm233_vm1, %v604_v43 }
 0xc0c   :  { %1221 = vmatpush3.bf16.msra.mxu1 %v1860_v2  ;;  %1224 = vmatprep.mubr.msk.bf16.mxu1 %vm1642_vm0, %v1641_v0 }
 0xc0d   :  { %1222 = vmatprep.subr.bf16.mxu1 %v1641_v0 }
 0xc10   :  { %1223 = vmatpush3.bf16.msra.mxu1 %v1864_v4 }
 0xc11   :  { %1236 = vmatprep.subr.bf16.mxu1 %v1641_v0 }
 0xcde   :  { %v642_v44 = vpop.f32.mrb[8].mxu1 }
 0xcdf   :  { %v649_v45 = vrot.slane %v642_v44, 4  ;;  %v1210_v46 = vpop.f32.mrb[9].mxu1 }
 0xce0   :  { %v645_v47 = vpop.f32.mrb[10].mxu1 }
 0xce1   :  { %v651_v48 = vadd.f32 %v649_v45, %v1886_v10  ;;  %v1211_v49 = vpop.f32.mrb[11].mxu1 }
 0xce3   :  { %1300 = vtanh.f32 %v651_v48  ;;  %v1116_v51 = vmul.f32 -1.442695, %v651_v48 }
 0xce5   :  { %1302 = vpow2.f32 %v1116_v51 }
 0xced   :  { %v1301_v50 = vpop.eup %1300 }
 0xcee   :  { %664 = vrot.lane.b32.xlu0 %v1301_v50, %s1630_s0 }
 0xcef   :  { %v1303_v52 = vpop.eup %1302 }
 0xcf0   :  { %v655_v53 = vadd.f32 1.0, %v1303_v52 }
 0xcf2   :  { %1304 = vrcp.f32 %v655_v53 }
 0xcfc   :  { %v1305_v54 = vpop.eup %1304 }
 0xcfd   :  { %v662_v58 = vmul.f32 %v1305_v54, %v660_v57 }
 0xd60   :  { %v665_v55 = vpop.permute.xlu0 %664 }
 0xd61   :  { %v667_v56 = vmul.f32 %v1305_v54, %v665_v55 }
 0xd63   :  { %669 = vrot.lane.b32.xlu1 %v667_v56, %s1644_s4 }
 0xdd5   :  { %v670_v59 = vpop.permute.xlu1 %669 }
 0xdd6   :  { %v672_v60 = vadd.f32 %v670_v59, %v662_v58 }
 0xdd8   :  { %1306 = vtanh.f32 %v672_v60 }
 0xde2   :  { %v1307_v61 = vpop.eup %1306 }
 0xde3   :  { %675 = vrot.lane.b32.xlu0 %v1307_v61, %s1630_s0 }
 0xe55   :  { %v676_v62 = vpop.permute.xlu0 %675 }
 0xe56   :  { %v678_v63 = vmul.f32 %v1305_v54, %v676_v62 }
 0xe58   :  { %v679_v1 = vpack.c.bf16 %v678_v63, %v678_v63 }
 0xe5a   :  { %v681_v3 = vrot.slane %v679_v1, 2 }
 0xe5c   :  { %682 = vrot.lane.b32.xlu1 %v681_v3, %s1644_s4 }
 0xece   :  { %v683_v5 = vpop.permute.xlu1 %682 }
 0xecf   :  { %1217 = vmatmul.mubr.msk.bf16.vlgmr.msra.gmra.mrb[12].mxu0 %vm233_vm1, %v683_v5 }
 0xed0   :  { %1229 = vmatpush3.bf16.msra.mxu0 %v1860_v2  ;;  %1232 = vmatprep.mubr.msk.bf16.mxu0 %vm1642_vm0, %v1641_v0 }
 0xed1   :  { %1230 = vmatprep.subr.bf16.mxu0 %v1641_v0 }
 0xed4   :  { %1231 = vmatpush3.bf16.msra.mxu0 %v1864_v4  ;;  %v739_v4 = vrot.slane %v672_v60, 7 }
 0xfa2   :  { %v721_v6 = vpop.f32.mrb[12].mxu0 }
 0xfa3   :  { %v728_v7 = vrot.slane %v721_v6, 3  ;;  %v1218_v8 = vpop.f32.mrb[13].mxu0 }
 0xfa4   :  { %v724_v9 = vpop.f32.mrb[14].mxu0  ;;  %v1267_v8 = vld [vmem:[%s1994_s5 + $0x8] sm:$0xff]  }
 0xfa5   :  { %v730_v11 = vadd.f32 %v728_v7, %v1886_v10  ;;  %v1219_v12 = vpop.f32.mrb[15].mxu0 }
 0xfa7   :  { %1308 = vtanh.f32 %v730_v11  ;;  %v1118_v14 = vmul.f32 -1.442695, %v730_v11 }
 0xfa9   :  { %1310 = vpow2.f32 %v1118_v14 }
 0xfb1   :  { %v1309_v13 = vpop.eup %1308 }
 0xfb2   :  { %743 = vrot.lane.b32.xlu0 %v1309_v13, %s1630_s0 }
 0xfb3   :  { %v1311_v2 = vpop.eup %1310 }
 0xfb4   :  { %v734_v15 = vadd.f32 1.0, %v1311_v2 }
 0xfb6   :  { %1312 = vrcp.f32 %v734_v15 }
 0xfc0   :  { %v1313_v16 = vpop.eup %1312 }
 0xfc1   :  { %v741_v19 = vmul.f32 %v1313_v16, %v739_v4 }
0x1024   :  { %v744_v17 = vpop.permute.xlu0 %743 }
0x1025   :  { %v746_v18 = vmul.f32 %v1313_v16, %v744_v17 }
0x1027   :  { %748 = vrot.lane.b32.xlu1 %v746_v18, %s1644_s4 }
0x1099   :  { %v749_v20 = vpop.permute.xlu1 %748 }
0x109a   :  { %v751_v21 = vadd.f32 %v749_v20, %v741_v19 }
0x109c   :  { %1314 = vtanh.f32 %v751_v21  ;;  %v820_v42 = vrot.slane %v751_v21, 7 }
0x10a6   :  { %v1315_v22 = vpop.eup %1314 }
0x10a7   :  { %754 = vrot.lane.b32.xlu0 %v1315_v22, %s1630_s0 }
0x1119   :  { %v755_v23 = vpop.permute.xlu0 %754 }
0x111a   :  { %v757_v24 = vmul.f32 %v1313_v16, %v755_v23  ;;  %v923_v16 = vld [vmem:[%s1995_s6] sm:$0x1] }
0x111c   :  { %v758_v25 = vpack.c.bf16 %v757_v24, %v757_v24 }
0x111e   :  { %v760_v26 = vshrl.u32 %v758_v25, 16 }
0x1120   :  { %v762_v27 = vrot.slane %v760_v26, 2 }
0x1122   :  { %763 = vrot.lane.b32.xlu1 %v762_v27, %s1644_s4 }
0x1194   :  { %v764_v28 = vpop.permute.xlu1 %763 }
0x1195   :  { %1225 = vmatmul.mubr.msk.bf16.vlgmr.msra.gmra.mrb[12].mxu1 %vm233_vm1, %v764_v28 }
0x1196   :  { %1240 = vmatprep.mubr.msk.bf16.mxu1 %vm1642_vm0, %v1641_v0 }
0x1268   :  { %v802_v29 = vpop.f32.mrb[12].mxu1 }
0x1269   :  { %v809_v30 = vrot.slane %v802_v29, 2  ;;  %v1226_v31 = vpop.f32.mrb[13].mxu1 }
0x126a   :  { %v805_v32 = vpop.f32.mrb[14].mxu1 }
0x126b   :  { %v811_v33 = vadd.f32 %v809_v30, %v1886_v10  ;;  %v1227_v34 = vpop.f32.mrb[15].mxu1 }
0x126d   :  { %1316 = vtanh.f32 %v811_v33  ;;  %v1120_v36 = vmul.f32 -1.442695, %v811_v33 }
0x126f   :  { %1318 = vpow2.f32 %v1120_v36 }
0x1277   :  { %v1317_v35 = vpop.eup %1316 }
0x1278   :  { %824 = vrot.lane.b32.xlu0 %v1317_v35, %s1630_s0 }
0x1279   :  { %v1319_v37 = vpop.eup %1318 }
0x127a   :  { %v815_v38 = vadd.f32 1.0, %v1319_v37 }
0x127c   :  { %1320 = vrcp.f32 %v815_v38 }
0x1286   :  { %v1321_v39 = vpop.eup %1320 }
0x1287   :  { %v822_v43 = vmul.f32 %v1321_v39, %v820_v42 }
0x12ea   :  { %v825_v40 = vpop.permute.xlu0 %824 }
0x12eb   :  { %v827_v41 = vmul.f32 %v1321_v39, %v825_v40 }
0x12ed   :  { %829 = vrot.lane.b32.xlu1 %v827_v41, %s1644_s4 }
0x135f   :  { %v830_v44 = vpop.permute.xlu1 %829 }
0x1360   :  { %v832_v45 = vadd.f32 %v830_v44, %v822_v43 }
0x1362   :  { %1322 = vtanh.f32 %v832_v45  ;;  %v899_v3 = vrot.slane %v832_v45, 7 }
0x136c   :  { %v1323_v46 = vpop.eup %1322 }
0x136d   :  { %835 = vrot.lane.b32.xlu0 %v1323_v46, %s1630_s0 }
0x13df   :  { %v836_v47 = vpop.permute.xlu0 %835 }
0x13e0   :  { %v838_v48 = vmul.f32 %v1321_v39, %v836_v47 }
0x13e2   :  { %v839_v49 = vpack.c.bf16 %v838_v48, %v838_v48 }
0x13e4   :  { %v841_v50 = vrot.slane %v839_v49, 3 }
0x13e6   :  { %842 = vrot.lane.b32.xlu1 %v841_v50, %s1644_s4 }
0x1458   :  { %v843_v51 = vpop.permute.xlu1 %842 }
0x1459   :  { %1233 = vmatmul.mubr.msk.bf16.vlgmr.msra.gmra.mrb[16].mxu0 %vm233_vm1, %v843_v51 }
0x152c   :  { %v881_v52 = vpop.f32.mrb[16].mxu0 }
0x152d   :  { %v888_v53 = vrot.slane %v881_v52, 1  ;;  %v1234_v54 = vpop.f32.mrb[17].mxu0 }
0x152e   :  { %v884_v55 = vpop.f32.mrb[18].mxu0 }
0x152f   :  { %v890_v56 = vadd.f32 %v888_v53, %v1886_v10  ;;  %v1235_v57 = vpop.f32.mrb[19].mxu0  ;;  %v1266_v10 = vld [vmem:[%s1994_s5] sm:$0xff]   ;;  %s1645_s5 = smov [#allocation11]  }
0x1530   :  { %1237 = vmatpush3.bf16.msra.mxu1 %v1266_v10  ;;  %s1005_s6 = sshll.u32 %s1645_s5, 4  ;;  %s1006_s6 = int_to_ptr.vmem [resolvable:$true] %s1005_s6 }
0x1531   :  { %1324 = vtanh.f32 %v890_v56  ;;  %v1122_v59 = vmul.f32 -1.442695, %v890_v56  ;;  %1238 = vmatprep.subr.bf16.mxu1 %v1641_v0  ;;  %s1586_s21 = scalar_lea.vmem %s1006_s6, 32  ;;  %p1587_p4 = scmp.lt.s32.totalorder %s1006_s6, %s1006_s6 }
0x1533   :  { %1326 = vpow2.f32 %v1122_v59 }
0x1534   :  { %1239 = vmatpush3.bf16.msra.mxu1 %v1267_v8 }
0x153b   :  { %v1325_v58 = vpop.eup %1324 }
0x153c   :  { %903 = vrot.lane.b32.xlu0 %v1325_v58, %s1630_s0 }
0x153d   :  { %v1327_v60 = vpop.eup %1326 }
0x153e   :  { %v894_v61 = vadd.f32 1.0, %v1327_v60 }
0x1540   :  { %1328 = vrcp.f32 %v894_v61 }
0x154a   :  { %v1329_v62 = vpop.eup %1328 }
0x154b   :  { %v901_v5 = vmul.f32 %v1329_v62, %v899_v3 }
0x15ae   :  { %v904_v63 = vpop.permute.xlu0 %903 }
0x15af   :  { %v906_v1 = vmul.f32 %v1329_v62, %v904_v63 }
0x15b1   :  { %908 = vrot.lane.b32.xlu1 %v906_v1, %s1644_s4 }
0x1623   :  { %v909_v6 = vpop.permute.xlu1 %908 }
0x1624   :  { %v911_v7 = vadd.f32 %v909_v6, %v901_v5 }
0x1626   :  { %1330 = vtanh.f32 %v911_v7 }
0x1630   :  { %v1331_v9 = vpop.eup %1330 }
0x1631   :  { %914 = vrot.lane.b32.xlu0 %v1331_v9, %s1630_s0  ;;  %s1582_s0 = scalar_lea.vmem %s1006_s6, 16 }
0x1632   :  { %p1583_p3 = scmp.ne.s32.totalorder %s1006_s6, %s1582_s0  ;;  %p1588_p5 = scmp.lt.s32.totalorder %s1586_s21, %s1582_s0 }
0x1634   :  { %p1589_p6 = por %p1588_p5, %p1587_p4 }
0x1636   :  { %p1590_p7 = pnand %p1589_p6, %p1583_p3 }
0x16a3   :  { %v915_v11 = vpop.permute.xlu0 %914 }
0x16a4   :  { %v917_v12 = vmul.f32 %v1329_v62, %v915_v11 }
0x16a6   :  { %v918_v13 = vpack.c.bf16 %v917_v12, %v917_v12 }
0x16a8   :  { %v925_v14 = vshrl.u32 %v918_v13, 16 }
0x16aa   :  { %v927_v2 = vrot.slane %v925_v14, 3 }
0x16ac   :  { %928 = vrot.lane.b32.xlu1 %v927_v2, %s1644_s4 }
0x171e   :  { %v929_v15 = vpop.permute.xlu1 %928 }
0x171f   :  { %1241 = vmatmul.mubr.msk.bf16.vlgmr.msra.gmra.mrb[16].mxu1 %vm233_vm1, %v929_v15 }
0x17f2   :  { %v979_v17 = vpop.f32.mrb[16].mxu1 }
0x17f3   :  { %v980_v0 = vadd.f32 %v979_v17, %v923_v16  ;;  %v1242_v18 = vpop.f32.mrb[17].mxu1 }
0x17f4   :  { %v982_v4 = vpop.f32.mrb[18].mxu1 }
0x17f5   :  { %v1243_v19 = vpop.f32.mrb[19].mxu1  ;;  %v986_v20 = vsel %vm985_vm2, %v980_v0, -inf }
0x17f6   :  { %987 = vmax.xlane.f32.xlu0 %v986_v20 }
0x1883   :  { %v988_v21 = vpop.xlane.xlu0 %987 }
0x1884   :  { %v989_v22 = vsub.f32 %v980_v0, %v988_v21 }
0x1886   :  { %v990_v23 = vmul.f32 1.442695, %v989_v22 }
0x1888   :  { %1332 = vpow2.f32 %v990_v23 }
0x1892   :  { %v1333_v24 = vpop.eup %1332 }
0x1893   :  { %v992_v25 = vsel %vm985_vm2, %v1333_v24, 0.0 }
0x1894   :  { %993 = vadd.xlane.f32.xlu1 %v992_v25 }
0x1921   :  { %v994_v26 = vpop.xlane.xlu1 %993 }
0x1922   :  { %1334 = vlog2.f32 %v994_v26 }
0x192c   :  { %v1335_v27 = vpop.eup %1334 }
0x192d   :  { %v996_v28 = vmul.f32 0.6931472, %v1335_v27 }
0x192f   :  { %v997_v29 = vsub.f32 %v989_v22, %v996_v28 }
0x1931   :  { %998 = vst [vmem:[#allocation11] sm:$0x1] %v997_v29 }
0x1932   :  { %1593 = shalt.err (!%p1590_p7)
}
0x1933   :  { %s1594_s25 = scalar_lea.hbm %s1996_s7, 16 }
0x1934   :  { %p1595_p8 = scmp.ne.s32.totalorder %s1996_s7, %s1594_s25  ;;  %p1598_p9 = scmp.lt.u32.totalorder %s1594_s25, %s1996_s7 }
0x1936   :  { %p1600_p10 = pnand %p1598_p9, %p1595_p8 }
0x1938   :  { %1603 = shalt.err (!%p1600_p10)
}
0x1939   :  { %1008 = dma.vmem_to_hbm [thread:$0]  %s1006_s6, 16, %s1996_s7, [#allocation6]  }
0x193a   :  { %1626 = dma.done.wait [#allocation6], 16  }
0x193b   :  { %1627 = vsyncadd [#allocation6], 4294967280 }
0x193c   :  { %1012 = vsyncpa [#allocation5], 1 }
0x193d   :  { %1013 = vsyncpa [#allocation10], 1 }
0x193e   :  { %1014 = vsyncpa [#allocation6], 1 }
0x193f   :  { %1015 = vsyncpa [#allocation7], 1 }
0x1940   :  { %1016 = vsyncmov [#allocation3] }
0x1943   :  { %s1017_s28 = vpop.sfrf %1016 }
0x1944   :  { %p1126_p11 = scmp.ne.s32.totalorder %s1017_s28, 0 }
0x1946   :  { %1021 = shalt.err (%p1126_p11)  }
0x1947   :  { %1023 = vsyncmov [#allocation3 + $0x1] }
0x194a   :  { %s1024_s30 = vpop.sfrf %1023 }
0x194b   :  { %p1127_p12 = scmp.ne.s32.totalorder %s1024_s30, 0 }
0x194d   :  { %1028 = shalt.err (%p1127_p12)  }
0x194e   :  { %1030 = vsyncmov [#allocation3 + $0x2] }
0x1951   :  { %s1031_s8 = vpop.sfrf %1030 }
0x1952   :  { %p1128_p13 = scmp.ne.s32.totalorder %s1031_s8, 0 }
0x1954   :  { %1035 = shalt.err (%p1128_p13)  }
0x1955   :  { %1037 = vsyncmov [#allocation3 + $0x3] }
0x1958   :  { %s1038_s7 = vpop.sfrf %1037 }
0x1959   :  { %p1129_p0 = scmp.ne.s32.totalorder %s1038_s7, 0 }
0x195b   :  { %1042 = shalt.err (%p1129_p0)  }
0x195c   :  { %1044 = vsyncmov [#allocation3 + $0x4] }
0x195f   :  { %s1045_s2 = vpop.sfrf %1044 }
0x1960   :  { %p1130_p1 = scmp.ne.s32.totalorder %s1045_s2, 0 }
0x1962   :  { %1049 = shalt.err (%p1130_p1)  }
0x1963   :  { %1051 = vsyncmov [#allocation3 + $0x5] }
0x1966   :  { %s1052_s11 = vpop.sfrf %1051 }
0x1967   :  { %p1131_p2 = scmp.ne.s32.totalorder %s1052_s11, 0 }
0x1969   :  { %1056 = shalt.err (%p1131_p2)  }
0x196a   :  { %1058 = vsyncmov [#allocation3 + $0x6] }
0x196d   :  { %s1059_s12 = vpop.sfrf %1058 }
0x196e   :  { %p1132_p3 = scmp.ne.s32.totalorder %s1059_s12, 0 }
0x1970   :  { %1063 = shalt.err (%p1132_p3)  }
0x1971   :  { %1065 = vsyncmov [#allocation3 + $0x7] }
0x1974   :  { %s1066_s13 = vpop.sfrf %1065 }
0x1975   :  { %p1133_p4 = scmp.ne.s32.totalorder %s1066_s13, 0 }
0x1977   :  { %1070 = shalt.err (%p1133_p4)  }

</bundles_post_ra>
